<compile_context>
chip_gen: v5e
topology: v5e:2x2
jax: 0.10.0
libtpu: 0.0.40
codegen_flags: <defaults>
</compile_context>

<pallas_src>
import jax
import jax.numpy as jnp
from jax.experimental import pallas as pl
from jax.experimental.pallas import tpu as pltpu

# ---- tiny synthetic BERT config (small shapes, deterministic params) --------
B, S = 2, 8            # batch, sequence length
H, NH, DH = 32, 4, 8   # hidden, num heads, head dim
FF = 64                # intermediate size
LAYERS = 2             # transformer layers
OUT_DIM = 32           # params['out_dim'] for the additional linear
VOCAB, TYPE_VOCAB, MAX_POS = 100, 2, 16
LN_EPS = 1e-12
M_TOK = B * S          # total tokens per tower call


# -------------------------- fused encoder kernel -----------------------------
def _encoder_kernel(emb_ref, bias_ref, sel_ref, eg_ref, eb_ref,
                    wqkv_ref, bqkv_ref, wo_ref, bo_ref,
                    ln1g_ref, ln1b_ref, w1_ref, b1_ref, w2_ref, b2_ref,
                    ln2g_ref, ln2b_ref,
                    pw_ref, pb_ref, aw_ref, ab_ref,
                    out_ref, x_scr):
    layer = pl.program_id(0)
    scale = 1.0 / (float(DH) ** 0.5)

    def layernorm(y, g, b):
        mu = jnp.mean(y, axis=-1, keepdims=True)
        var = jnp.mean(jnp.square(y - mu), axis=-1, keepdims=True)
        return (y - mu) * jax.lax.rsqrt(var + LN_EPS) * g + b

    # ---- embedding LayerNorm, fused into the first layer step ----
    @pl.when(layer == 0)
    def _():
        x_scr[...] = layernorm(emb_ref[...], eg_ref[...], eb_ref[...])

    x = x_scr[...]                                # (M_TOK, H) f32, resident in VMEM
    xb = x.astype(jnp.bfloat16)

    # ---- fused QKV projection: one (H, 3H) matmul ----
    qkv = jnp.dot(xb, wqkv_ref[0],
                  preferred_element_type=jnp.float32) + bqkv_ref[0]   # (M_TOK, 3H) f32

    # ---- multi-head attention + output projection (per-head, no concat) ----
    bias = bias_ref[...]                          # (M_TOK, M_TOK) additive mask bias
    wo = wo_ref[0]                                # (H, H) bf16
    attn = jnp.zeros((M_TOK, H), jnp.float32)
    for h in range(NH):                           # NH=4, statically unrolled
        qh = qkv[:, h * DH:(h + 1) * DH]
        kh = qkv[:, H + h * DH:H + (h + 1) * DH]
        vh = qkv[:, 2 * H + h * DH:2 * H + (h + 1) * DH]
        s_h = jnp.dot(qh, kh.T, preferred_element_type=jnp.float32) * scale + bias
        s_h = s_h - jnp.max(s_h, axis=-1, keepdims=True)      # stable softmax (f32)
        p_h = jnp.exp(s_h)
        p_h = p_h * pl.reciprocal(jnp.sum(p_h, axis=-1, keepdims=True), approx=True)
        c_h = jnp.dot(p_h, vh, preferred_element_type=jnp.float32)     # (M_TOK, DH)
        attn = attn + jnp.dot(c_h.astype(jnp.bfloat16),
                              wo[h * DH:(h + 1) * DH, :],
                              preferred_element_type=jnp.float32)
    # attn-out dense + residual + LayerNorm (fused)
    x = layernorm(attn + bo_ref[0] + x, ln1g_ref[0], ln1b_ref[0])

    # ---- FFN: w1 + GELU + w2 + residual + LayerNorm (fused) ----
    xb = x.astype(jnp.bfloat16)
    h1 = jnp.dot(xb, w1_ref[0], preferred_element_type=jnp.float32) + b1_ref[0]
    # TODO(synk): HF BERT default is exact erf-GELU; using tanh-approx GELU
    # (EUP tanh) to stay within guaranteed Mosaic lowerings.
    h1 = jax.nn.gelu(h1, approximate=True)
    ffn = jnp.dot(h1.astype(jnp.bfloat16), w2_ref[0],
                  preferred_element_type=jnp.float32) + b2_ref[0]
    x = layernorm(ffn + x, ln2g_ref[0], ln2b_ref[0])
    x_scr[...] = x                                # carry to next layer

    # ---- BERT pooler + additional_linear, fused into the last layer step ----
    @pl.when(layer == LAYERS - 1)
    def _():
        cls = jnp.dot(sel_ref[...], x, preferred_element_type=jnp.float32)   # (B, H)
        pooled = jnp.tanh(jnp.dot(cls.astype(jnp.bfloat16), pw_ref[...],
                                  preferred_element_type=jnp.float32) + pb_ref[...])
        # nn.Dropout(0.1) is identity in eval mode.
        out_ref[...] = (jnp.dot(pooled.astype(jnp.bfloat16), aw_ref[...],
                                preferred_element_type=jnp.float32)
                        + ab_ref[...]).astype(out_ref.dtype)


def bert_encoder_pallas(p, emb, bias, sel):
    """Whole BertEncoder (embedding LN -> L layers -> pooler -> linear), 1 pallas_call."""
    M = emb.shape[0]
    Bc = sel.shape[0]

    def full2d(r, c):
        return pl.BlockSpec((r, c), lambda l: (0, 0))

    def per_layer(r, c):
        return pl.BlockSpec((1, r, c), lambda l: (l, 0, 0))

    # TODO(synk): for real BERT sizes (H=768+, S>=256) the dense/FFN matmuls
    # would use a tiled (M, N, K) grid with 128/256 tiles; at these demo shapes
    # everything fits in VMEM in one block.
    grid_spec = pltpu.PrefetchScalarGridSpec(
        num_scalar_prefetch=0,
        grid=(LAYERS,),
        in_specs=[
            full2d(M, H),                                  # summed embeddings
            full2d(M, M),                                  # attention mask bias
            full2d(Bc, M),                                 # CLS selector matrix
            full2d(1, H), full2d(1, H),                    # embedding LN gamma/beta
            per_layer(H, 3 * H), per_layer(1, 3 * H),      # fused QKV weight/bias
            per_layer(H, H), per_layer(1, H),              # attn output proj
            per_layer(1, H), per_layer(1, H),              # LN1 gamma/beta
            per_layer(H, FF), per_layer(1, FF),            # FFN w1/b1
            per_layer(FF, H), per_layer(1, H),             # FFN w2/b2
            per_layer(1, H), per_layer(1, H),              # LN2 gamma/beta
            full2d(H, H), full2d(1, H),                    # pooler weight/bias
            full2d(H, OUT_DIM), full2d(1, OUT_DIM),        # additional_linear
        ],
        out_specs=pl.BlockSpec((Bc, OUT_DIM), lambda l: (0, 0)),
        scratch_shapes=[pltpu.VMEM((M, H), jnp.float32)],
    )
    return pl.pallas_call(
        _encoder_kernel,
        out_shape=jax.ShapeDtypeStruct((Bc, OUT_DIM), jnp.float32),
        grid_spec=grid_spec,
        compiler_params=pltpu.CompilerParams(
            dimension_semantics=("arbitrary",)),   # layer axis carries state
    )(emb, bias, sel, p["emb_ln_g"], p["emb_ln_b"],
      p["wqkv"], p["bqkv"], p["wo"], p["bo"], p["ln1_g"], p["ln1_b"],
      p["w1"], p["b1"], p["w2"], p["b2"], p["ln2_g"], p["ln2_b"],
      p["pool_w"], p["pool_b"], p["add_w"], p["add_b"])


# -------------------------- parameter construction ---------------------------
def _linear(key, fan_in, fan_out):
    kw, kb = jax.random.split(key)
    w = jax.random.normal(kw, (fan_in, fan_out), jnp.float32) * 0.02
    b = jax.random.normal(kb, (fan_out,), jnp.float32) * 0.02
    return w, b


def init_bert_encoder_params(key):
    keys = iter(jax.random.split(key, 8 + 10 * LAYERS))
    p = {
        "word_emb": jax.random.normal(next(keys), (VOCAB, H), jnp.float32) * 0.02,
        "pos_emb": jax.random.normal(next(keys), (MAX_POS, H), jnp.float32) * 0.02,
        "type_emb": jax.random.normal(next(keys), (TYPE_VOCAB, H), jnp.float32) * 0.02,
        "emb_ln_g": jnp.ones((1, H), jnp.float32),
        "emb_ln_b": jnp.zeros((1, H), jnp.float32),
    }
    wqkv, bqkv, wo, bo, w1, b1, w2, b2 = [], [], [], [], [], [], [], []
    ln1g, ln1b, ln2g, ln2b = [], [], [], []
    for _ in range(LAYERS):
        wq, bq = _linear(next(keys), H, H)
        wk, bk = _linear(next(keys), H, H)
        wv, bv = _linear(next(keys), H, H)
        wqkv.append(jnp.concatenate([wq, wk, wv], axis=1))   # fused QKV weight
        bqkv.append(jnp.concatenate([bq, bk, bv], axis=0))
        w, b = _linear(next(keys), H, H);  wo.append(w); bo.append(b)
        w, b = _linear(next(keys), H, FF); w1.append(w); b1.append(b)
        w, b = _linear(next(keys), FF, H); w2.append(w); b2.append(b)
        ln1g.append(jnp.ones((H,), jnp.float32)); ln1b.append(jnp.zeros((H,), jnp.float32))
        ln2g.append(jnp.ones((H,), jnp.float32)); ln2b.append(jnp.zeros((H,), jnp.float32))

    stack_w = lambda xs: jnp.stack(xs).astype(jnp.bfloat16)              # (L, in, out) bf16
    stack_v = lambda xs: jnp.stack(xs)[:, None, :].astype(jnp.float32)   # (L, 1, out) f32
    p.update(
        wqkv=stack_w(wqkv), bqkv=stack_v(bqkv),
        wo=stack_w(wo), bo=stack_v(bo),
        ln1_g=stack_v(ln1g), ln1_b=stack_v(ln1b),
        w1=stack_w(w1), b1=stack_v(b1),
        w2=stack_w(w2), b2=stack_v(b2),
        ln2_g=stack_v(ln2g), ln2_b=stack_v(ln2b),
    )
    pw, pb = _linear(next(keys), H, H)
    aw, ab = _linear(next(keys), H, OUT_DIM)
    p["pool_w"] = pw.astype(jnp.bfloat16)
    p["pool_b"] = pb[None, :].astype(jnp.float32)
    p["add_w"] = aw.astype(jnp.bfloat16)
    p["add_b"] = ab[None, :].astype(jnp.float32)
    return p


# -------------------------- forward pass --------------------------------------
def bert_encoder_forward(p, token_idx, segment_idx, mask):
    """BertEncoder(add_linear=True): BERT -> pooler -> dropout(eval) -> linear."""
    Bc, Sc = token_idx.shape
    # Embedding gathers stay in JAX (table lookups have no clean Pallas win here).
    emb = (p["word_emb"][token_idx]
           + p["pos_emb"][jnp.arange(Sc)][None, :, :]
           + p["type_emb"][segment_idx]).astype(jnp.float32).reshape(Bc * Sc, H)

    # Additive attention bias over the concatenated token axis:
    #   -10000 for padded keys (HF BERT), -1e9 for cross-batch pairs so the
    #   blocked softmax is exactly equal to per-batch softmax.
    tok_batch = jnp.repeat(jnp.arange(Bc), Sc)
    same_batch = tok_batch[:, None] == tok_batch[None, :]
    key_pad_bias = (1.0 - mask.astype(jnp.float32).reshape(-1)) * -10000.0
    bias = jnp.where(same_batch, key_pad_bias[None, :], -1e9).astype(jnp.float32)

    # CLS selector: picks row b*S for each batch element with a tiny matmul.
    sel = (jnp.arange(Bc * Sc)[None, :] == (jnp.arange(Bc) * Sc)[:, None]).astype(jnp.float32)

    return bert_encoder_pallas(p, emb, bias, sel)


@jax.jit
def biencoder_forward(params, token_idx_ctxt, segment_idx_ctxt, mask_ctxt,
                      token_idx_cands, segment_idx_cands, mask_cands):
    embedding_ctxt = None
    if token_idx_ctxt is not None:
        embedding_ctxt = bert_encoder_forward(
            params["ctxt"], token_idx_ctxt, segment_idx_ctxt, mask_ctxt)
    embedding_cands = None
    if token_idx_cands is not None:
        embedding_cands = bert_encoder_forward(
            params["cand"], token_idx_cands, segment_idx_cands, mask_cands)
    return embedding_ctxt, embedding_cands


# -------------------------- demo / smoke test ---------------------------------
if __name__ == "__main__":
    root = jax.random.PRNGKey(0)
    k_ctxt, k_cand, k_tok1, k_tok2 = jax.random.split(root, 4)

    params = {
        "ctxt": init_bert_encoder_params(k_ctxt),
        "cand": init_bert_encoder_params(k_cand),
    }

    token_idx_ctxt = jax.random.randint(k_tok1, (B, S), 0, VOCAB, dtype=jnp.int32)
    segment_idx_ctxt = jnp.zeros((B, S), jnp.int32)
    mask_ctxt = jnp.ones((B, S), jnp.int32)

    token_idx_cands = jax.random.randint(k_tok2, (B, S), 0, VOCAB, dtype=jnp.int32)
    segment_idx_cands = jnp.ones((B, S), jnp.int32)
    mask_cands = jnp.concatenate(
        [jnp.ones((B, S - 2), jnp.int32), jnp.zeros((B, 2), jnp.int32)], axis=1)

    emb_ctxt, emb_cands = biencoder_forward(
        params, token_idx_ctxt, segment_idx_ctxt, mask_ctxt,
        token_idx_cands, segment_idx_cands, mask_cands)

    emb_ctxt = jax.block_until_ready(emb_ctxt)
    emb_cands = jax.block_until_ready(emb_cands)

    assert emb_ctxt.shape == (B, OUT_DIM) and emb_cands.shape == (B, OUT_DIM)
    assert bool(jnp.all(jnp.isfinite(emb_ctxt))) and bool(jnp.all(jnp.isfinite(emb_cands)))
    print("KERNEL_OK")
</pallas_src>

<mosaic_0001>
module attributes {stable_mosaic.version = 11 : i64} {
  func.func @_encoder_kernel(%arg0: i32, %arg1: memref<16x32xf32, #tpu.memory_space<vmem>>, %arg2: memref<16x16xf32, #tpu.memory_space<vmem>>, %arg3: memref<2x16xf32, #tpu.memory_space<vmem>>, %arg4: memref<1x32xf32, #tpu.memory_space<vmem>>, %arg5: memref<1x32xf32, #tpu.memory_space<vmem>>, %arg6: memref<1x32x96xbf16, #tpu.memory_space<vmem>>, %arg7: memref<1x1x96xf32, #tpu.memory_space<vmem>>, %arg8: memref<1x32x32xbf16, #tpu.memory_space<vmem>>, %arg9: memref<1x1x32xf32, #tpu.memory_space<vmem>>, %arg10: memref<1x1x32xf32, #tpu.memory_space<vmem>>, %arg11: memref<1x1x32xf32, #tpu.memory_space<vmem>>, %arg12: memref<1x32x64xbf16, #tpu.memory_space<vmem>>, %arg13: memref<1x1x64xf32, #tpu.memory_space<vmem>>, %arg14: memref<1x64x32xbf16, #tpu.memory_space<vmem>>, %arg15: memref<1x1x32xf32, #tpu.memory_space<vmem>>, %arg16: memref<1x1x32xf32, #tpu.memory_space<vmem>>, %arg17: memref<1x1x32xf32, #tpu.memory_space<vmem>>, %arg18: memref<32x32xbf16, #tpu.memory_space<vmem>>, %arg19: memref<1x32xf32, #tpu.memory_space<vmem>>, %arg20: memref<32x32xbf16, #tpu.memory_space<vmem>>, %arg21: memref<1x32xf32, #tpu.memory_space<vmem>>, %arg22: memref<2x32xf32, #tpu.memory_space<vmem>>, %arg23: memref<16x32xf32, #tpu.memory_space<vmem>>) attributes {dimension_semantics = [#tpu.dimension_semantics<arbitrary>], iteration_bounds = array<i64: 2>, scalar_prefetch = 0 : i64, scratch_operands = 1 : i64, tpu.core_type = #tpu.core_type<tc>, window_params = [{pipeline_mode = #tpu.pipeline_mode<synchronous>, transform_indices = @transform_0, window_bounds = array<i64: 16, 32>}, {pipeline_mode = #tpu.pipeline_mode<synchronous>, transform_indices = @transform_1, window_bounds = array<i64: 16, 16>}, {pipeline_mode = #tpu.pipeline_mode<synchronous>, transform_indices = @transform_2, window_bounds = array<i64: 2, 16>}, {pipeline_mode = #tpu.pipeline_mode<synchronous>, transform_indices = @transform_3, window_bounds = array<i64: 1, 32>}, {pipeline_mode = #tpu.pipeline_mode<synchronous>, transform_indices = @transform_4, window_bounds = array<i64: 1, 32>}, {transform_indices = @transform_5, window_bounds = array<i64: 1, 32, 96>}, {transform_indices = @transform_6, window_bounds = array<i64: 1, 1, 96>}, {transform_indices = @transform_7, window_bounds = array<i64: 1, 32, 32>}, {transform_indices = @transform_8, window_bounds = array<i64: 1, 1, 32>}, {transform_indices = @transform_9, window_bounds = array<i64: 1, 1, 32>}, {transform_indices = @transform_10, window_bounds = array<i64: 1, 1, 32>}, {transform_indices = @transform_11, window_bounds = array<i64: 1, 32, 64>}, {transform_indices = @transform_12, window_bounds = array<i64: 1, 1, 64>}, {transform_indices = @transform_13, window_bounds = array<i64: 1, 64, 32>}, {transform_indices = @transform_14, window_bounds = array<i64: 1, 1, 32>}, {transform_indices = @transform_15, window_bounds = array<i64: 1, 1, 32>}, {transform_indices = @transform_16, window_bounds = array<i64: 1, 1, 32>}, {pipeline_mode = #tpu.pipeline_mode<synchronous>, transform_indices = @transform_17, window_bounds = array<i64: 32, 32>}, {pipeline_mode = #tpu.pipeline_mode<synchronous>, transform_indices = @transform_18, window_bounds = array<i64: 1, 32>}, {pipeline_mode = #tpu.pipeline_mode<synchronous>, transform_indices = @transform_19, window_bounds = array<i64: 32, 32>}, {pipeline_mode = #tpu.pipeline_mode<synchronous>, transform_indices = @transform_20, window_bounds = array<i64: 1, 32>}, {pipeline_mode = #tpu.pipeline_mode<synchronous>, transform_indices = @transform_21, window_bounds = array<i64: 2, 32>}]} {
    %c0_i32 = arith.constant 0 : i32
    %0 = arith.cmpi eq, %arg0, %c0_i32 : i32
    %1 = arith.extui %0 : i1 to i32
    %c0_i32_0 = arith.constant 0 : i32
    %2 = arith.cmpi ne, %1, %c0_i32_0 : i32
    scf.if %2 {
      %c0_84 = arith.constant 0 : index
      %c0_85 = arith.constant 0 : index
      %199 = vector.load %arg1[%c0_84, %c0_85] : memref<16x32xf32, #tpu.memory_space<vmem>>, vector<16x32xf32>
      %c0_86 = arith.constant 0 : index
      %c0_87 = arith.constant 0 : index
      %200 = vector.load %arg4[%c0_86, %c0_87] : memref<1x32xf32, #tpu.memory_space<vmem>>, vector<1x32xf32>
      %c0_88 = arith.constant 0 : index
      %c0_89 = arith.constant 0 : index
      %201 = vector.load %arg5[%c0_88, %c0_89] : memref<1x32xf32, #tpu.memory_space<vmem>>, vector<1x32xf32>
      %cst_90 = arith.constant dense<0.000000e+00> : vector<16xf32>
      %202 = vector.multi_reduction <add>, %199, %cst_90 [1] : vector<16x32xf32> to vector<16xf32>
      %203 = vector.shape_cast %202 : vector<16xf32> to vector<16x1xf32>
      %cst_91 = arith.constant 3.200000e+01 : f32
      %204 = vector.broadcast %cst_91 : f32 to vector<16x1xf32>
      %205 = arith.divf %203, %204 : vector<16x1xf32>
      %206 = vector.broadcast %205 : vector<16x1xf32> to vector<16x32xf32>
      %207 = arith.subf %199, %206 : vector<16x32xf32>
      %208 = arith.mulf %207, %207 : vector<16x32xf32>
      %cst_92 = arith.constant dense<0.000000e+00> : vector<16xf32>
      %209 = vector.multi_reduction <add>, %208, %cst_92 [1] : vector<16x32xf32> to vector<16xf32>
      %210 = vector.shape_cast %209 : vector<16xf32> to vector<16x1xf32>
      %cst_93 = arith.constant 3.200000e+01 : f32
      %211 = vector.broadcast %cst_93 : f32 to vector<16x1xf32>
      %212 = arith.divf %210, %211 : vector<16x1xf32>
      %213 = vector.broadcast %205 : vector<16x1xf32> to vector<16x32xf32>
      %214 = arith.subf %199, %213 : vector<16x32xf32>
      %cst_94 = arith.constant 9.99999996E-13 : f32
      %215 = vector.broadcast %cst_94 : f32 to vector<16x1xf32>
      %216 = arith.addf %212, %215 : vector<16x1xf32>
      %217 = math.rsqrt %216 : vector<16x1xf32>
      %218 = vector.broadcast %217 : vector<16x1xf32> to vector<16x32xf32>
      %219 = arith.mulf %214, %218 : vector<16x32xf32>
      %220 = vector.broadcast %200 : vector<1x32xf32> to vector<16x32xf32>
      %221 = arith.mulf %219, %220 : vector<16x32xf32>
      %222 = vector.broadcast %201 : vector<1x32xf32> to vector<16x32xf32>
      %223 = arith.addf %221, %222 : vector<16x32xf32>
      %c0_95 = arith.constant 0 : index
      %c0_96 = arith.constant 0 : index
      %224 = vector.load %arg23[%c0_95, %c0_96] : memref<16x32xf32, #tpu.memory_space<vmem>>, vector<16x32xf32>
      tpu.vector_store %arg23[%c0_95, %c0_96], %223 {strides = array<i32>} : memref<16x32xf32, #tpu.memory_space<vmem>>, vector<16x32xf32>,
    } else {
    }
    %c0 = arith.constant 0 : index
    %c0_1 = arith.constant 0 : index
    %3 = vector.load %arg23[%c0, %c0_1] : memref<16x32xf32, #tpu.memory_space<vmem>>, vector<16x32xf32>
    %4 = arith.truncf %3 : vector<16x32xf32> to vector<16x32xbf16>
    %c0_2 = arith.constant 0 : index
    %c0_3 = arith.constant 0 : index
    %c0_4 = arith.constant 0 : index
    %5 = vector.load %arg6[%c0_2, %c0_3, %c0_4] : memref<1x32x96xbf16, #tpu.memory_space<vmem>>, vector<1x32x96xbf16>
    %6 = vector.shape_cast %5 : vector<1x32x96xbf16> to vector<32x96xbf16>
    %cst = arith.constant dense<0.000000e+00> : vector<16x96xf32>
    %7 = tpu.matmul %4, %6, %cst {dimension_numbers = #tpu.dot_dimension_numbers<[1], [0], [0], [1], [0, 0, 1, 1], [], []>} : vector<16x32xbf16>, vector<32x96xbf16>, vector<16x96xf32> -> vector<16x96xf32>
    %c0_5 = arith.constant 0 : index
    %c0_6 = arith.constant 0 : index
    %c0_7 = arith.constant 0 : index
    %8 = vector.load %arg7[%c0_5, %c0_6, %c0_7] : memref<1x1x96xf32, #tpu.memory_space<vmem>>, vector<1x1x96xf32>
    %9 = vector.shape_cast %8 : vector<1x1x96xf32> to vector<1x96xf32>
    %10 = vector.broadcast %9 : vector<1x96xf32> to vector<16x96xf32>
    %11 = arith.addf %7, %10 : vector<16x96xf32>
    %c0_8 = arith.constant 0 : index
    %c0_9 = arith.constant 0 : index
    %12 = vector.load %arg2[%c0_8, %c0_9] : memref<16x16xf32, #tpu.memory_space<vmem>>, vector<16x16xf32>
    %c0_10 = arith.constant 0 : index
    %c0_11 = arith.constant 0 : index
    %c0_12 = arith.constant 0 : index
    %13 = vector.load %arg8[%c0_10, %c0_11, %c0_12] : memref<1x32x32xbf16, #tpu.memory_space<vmem>>, vector<1x32x32xbf16>
    %14 = vector.shape_cast %13 : vector<1x32x32xbf16> to vector<32x32xbf16>
    %cst_13 = arith.constant 0.000000e+00 : f32
    %15 = vector.broadcast %cst_13 : f32 to vector<16x32xf32>
    %16 = vector.extract_strided_slice %11 {offsets = [0, 0], sizes = [16, 8], strides = [1, 1]} : vector<16x96xf32> to vector<16x8xf32>
    %17 = vector.extract_strided_slice %11 {offsets = [0, 32], sizes = [16, 8], strides = [1, 1]} : vector<16x96xf32> to vector<16x8xf32>
    %18 = vector.extract_strided_slice %11 {offsets = [0, 64], sizes = [16, 8], strides = [1, 1]} : vector<16x96xf32> to vector<16x8xf32>
    %19 = tpu.transpose %17, [1, 0] : vector<16x8xf32> -> vector<8x16xf32>
    %cst_14 = arith.constant dense<0.000000e+00> : vector<16x16xf32>
    %20 = tpu.matmul %16, %19, %cst_14 {dimension_numbers = #tpu.dot_dimension_numbers<[1], [0], [0], [1], [0, 0, 1, 1], [], []>} : vector<16x8xf32>, vector<8x16xf32>, vector<16x16xf32> -> vector<16x16xf32>
    %cst_15 = arith.constant 0.353553385 : f32
    %21 = vector.broadcast %cst_15 : f32 to vector<16x16xf32>
    %22 = arith.mulf %20, %21 : vector<16x16xf32>
    %23 = arith.addf %22, %12 : vector<16x16xf32>
    %cst_16 = arith.constant dense<0xFF800000> : vector<16xf32>
    %24 = vector.multi_reduction <maximumf>, %23, %cst_16 [1] : vector<16x16xf32> to vector<16xf32>
    %25 = vector.shape_cast %24 : vector<16xf32> to vector<16x1xf32>
    %26 = vector.broadcast %25 : vector<16x1xf32> to vector<16x16xf32>
    %27 = arith.subf %23, %26 : vector<16x16xf32>
    %28 = math.exp %27 : vector<16x16xf32>
    %cst_17 = arith.constant dense<0.000000e+00> : vector<16xf32>
    %29 = vector.multi_reduction <add>, %28, %cst_17 [1] : vector<16x16xf32> to vector<16xf32>
    %30 = vector.shape_cast %29 : vector<16xf32> to vector<16x1xf32>
    %31 = tpu.reciprocal %30 {approx = true} : vector<16x1xf32> -> vector<16x1xf32>
    %32 = vector.broadcast %31 : vector<16x1xf32> to vector<16x16xf32>
    %33 = arith.mulf %28, %32 : vector<16x16xf32>
    %cst_18 = arith.constant dense<0.000000e+00> : vector<16x8xf32>
    %34 = tpu.matmul %33, %18, %cst_18 {dimension_numbers = #tpu.dot_dimension_numbers<[1], [0], [0], [1], [0, 0, 1, 1], [], []>} : vector<16x16xf32>, vector<16x8xf32>, vector<16x8xf32> -> vector<16x8xf32>
    %35 = arith.truncf %34 : vector<16x8xf32> to vector<16x8xbf16>
    %36 = vector.extract_strided_slice %14 {offsets = [0, 0], sizes = [8, 32], strides = [1, 1]} : vector<32x32xbf16> to vector<8x32xbf16>
    %cst_19 = arith.constant dense<0.000000e+00> : vector<16x32xf32>
    %37 = tpu.matmul %35, %36, %cst_19 {dimension_numbers = #tpu.dot_dimension_numbers<[1], [0], [0], [1], [0, 0, 1, 1], [], []>} : vector<16x8xbf16>, vector<8x32xbf16>, vector<16x32xf32> -> vector<16x32xf32>
    %38 = arith.addf %15, %37 : vector<16x32xf32>
    %39 = vector.extract_strided_slice %11 {offsets = [0, 8], sizes = [16, 8], strides = [1, 1]} : vector<16x96xf32> to vector<16x8xf32>
    %40 = vector.extract_strided_slice %11 {offsets = [0, 40], sizes = [16, 8], strides = [1, 1]} : vector<16x96xf32> to vector<16x8xf32>
    %41 = vector.extract_strided_slice %11 {offsets = [0, 72], sizes = [16, 8], strides = [1, 1]} : vector<16x96xf32> to vector<16x8xf32>
    %42 = tpu.transpose %40, [1, 0] : vector<16x8xf32> -> vector<8x16xf32>
    %cst_20 = arith.constant dense<0.000000e+00> : vector<16x16xf32>
    %43 = tpu.matmul %39, %42, %cst_20 {dimension_numbers = #tpu.dot_dimension_numbers<[1], [0], [0], [1], [0, 0, 1, 1], [], []>} : vector<16x8xf32>, vector<8x16xf32>, vector<16x16xf32> -> vector<16x16xf32>
    %cst_21 = arith.constant 0.353553385 : f32
    %44 = vector.broadcast %cst_21 : f32 to vector<16x16xf32>
    %45 = arith.mulf %43, %44 : vector<16x16xf32>
    %46 = arith.addf %45, %12 : vector<16x16xf32>
    %cst_22 = arith.constant dense<0xFF800000> : vector<16xf32>
    %47 = vector.multi_reduction <maximumf>, %46, %cst_22 [1] : vector<16x16xf32> to vector<16xf32>
    %48 = vector.shape_cast %47 : vector<16xf32> to vector<16x1xf32>
    %49 = vector.broadcast %48 : vector<16x1xf32> to vector<16x16xf32>
    %50 = arith.subf %46, %49 : vector<16x16xf32>
    %51 = math.exp %50 : vector<16x16xf32>
    %cst_23 = arith.constant dense<0.000000e+00> : vector<16xf32>
    %52 = vector.multi_reduction <add>, %51, %cst_23 [1] : vector<16x16xf32> to vector<16xf32>
    %53 = vector.shape_cast %52 : vector<16xf32> to vector<16x1xf32>
    %54 = tpu.reciprocal %53 {approx = true} : vector<16x1xf32> -> vector<16x1xf32>
    %55 = vector.broadcast %54 : vector<16x1xf32> to vector<16x16xf32>
    %56 = arith.mulf %51, %55 : vector<16x16xf32>
    %cst_24 = arith.constant dense<0.000000e+00> : vector<16x8xf32>
    %57 = tpu.matmul %56, %41, %cst_24 {dimension_numbers = #tpu.dot_dimension_numbers<[1], [0], [0], [1], [0, 0, 1, 1], [], []>} : vector<16x16xf32>, vector<16x8xf32>, vector<16x8xf32> -> vector<16x8xf32>
    %58 = arith.truncf %57 : vector<16x8xf32> to vector<16x8xbf16>
    %59 = vector.extract_strided_slice %14 {offsets = [8, 0], sizes = [8, 32], strides = [1, 1]} : vector<32x32xbf16> to vector<8x32xbf16>
    %cst_25 = arith.constant dense<0.000000e+00> : vector<16x32xf32>
    %60 = tpu.matmul %58, %59, %cst_25 {dimension_numbers = #tpu.dot_dimension_numbers<[1], [0], [0], [1], [0, 0, 1, 1], [], []>} : vector<16x8xbf16>, vector<8x32xbf16>, vector<16x32xf32> -> vector<16x32xf32>
    %61 = arith.addf %38, %60 : vector<16x32xf32>
    %62 = vector.extract_strided_slice %11 {offsets = [0, 16], sizes = [16, 8], strides = [1, 1]} : vector<16x96xf32> to vector<16x8xf32>
    %63 = vector.extract_strided_slice %11 {offsets = [0, 48], sizes = [16, 8], strides = [1, 1]} : vector<16x96xf32> to vector<16x8xf32>
    %64 = vector.extract_strided_slice %11 {offsets = [0, 80], sizes = [16, 8], strides = [1, 1]} : vector<16x96xf32> to vector<16x8xf32>
    %65 = tpu.transpose %63, [1, 0] : vector<16x8xf32> -> vector<8x16xf32>
    %cst_26 = arith.constant dense<0.000000e+00> : vector<16x16xf32>
    %66 = tpu.matmul %62, %65, %cst_26 {dimension_numbers = #tpu.dot_dimension_numbers<[1], [0], [0], [1], [0, 0, 1, 1], [], []>} : vector<16x8xf32>, vector<8x16xf32>, vector<16x16xf32> -> vector<16x16xf32>
    %cst_27 = arith.constant 0.353553385 : f32
    %67 = vector.broadcast %cst_27 : f32 to vector<16x16xf32>
    %68 = arith.mulf %66, %67 : vector<16x16xf32>
    %69 = arith.addf %68, %12 : vector<16x16xf32>
    %cst_28 = arith.constant dense<0xFF800000> : vector<16xf32>
    %70 = vector.multi_reduction <maximumf>, %69, %cst_28 [1] : vector<16x16xf32> to vector<16xf32>
    %71 = vector.shape_cast %70 : vector<16xf32> to vector<16x1xf32>
    %72 = vector.broadcast %71 : vector<16x1xf32> to vector<16x16xf32>
    %73 = arith.subf %69, %72 : vector<16x16xf32>
    %74 = math.exp %73 : vector<16x16xf32>
    %cst_29 = arith.constant dense<0.000000e+00> : vector<16xf32>
    %75 = vector.multi_reduction <add>, %74, %cst_29 [1] : vector<16x16xf32> to vector<16xf32>
    %76 = vector.shape_cast %75 : vector<16xf32> to vector<16x1xf32>
    %77 = tpu.reciprocal %76 {approx = true} : vector<16x1xf32> -> vector<16x1xf32>
    %78 = vector.broadcast %77 : vector<16x1xf32> to vector<16x16xf32>
    %79 = arith.mulf %74, %78 : vector<16x16xf32>
    %cst_30 = arith.constant dense<0.000000e+00> : vector<16x8xf32>
    %80 = tpu.matmul %79, %64, %cst_30 {dimension_numbers = #tpu.dot_dimension_numbers<[1], [0], [0], [1], [0, 0, 1, 1], [], []>} : vector<16x16xf32>, vector<16x8xf32>, vector<16x8xf32> -> vector<16x8xf32>
    %81 = arith.truncf %80 : vector<16x8xf32> to vector<16x8xbf16>
    %82 = vector.extract_strided_slice %14 {offsets = [16, 0], sizes = [8, 32], strides = [1, 1]} : vector<32x32xbf16> to vector<8x32xbf16>
    %cst_31 = arith.constant dense<0.000000e+00> : vector<16x32xf32>
    %83 = tpu.matmul %81, %82, %cst_31 {dimension_numbers = #tpu.dot_dimension_numbers<[1], [0], [0], [1], [0, 0, 1, 1], [], []>} : vector<16x8xbf16>, vector<8x32xbf16>, vector<16x32xf32> -> vector<16x32xf32>
    %84 = arith.addf %61, %83 : vector<16x32xf32>
    %85 = vector.extract_strided_slice %11 {offsets = [0, 24], sizes = [16, 8], strides = [1, 1]} : vector<16x96xf32> to vector<16x8xf32>
    %86 = vector.extract_strided_slice %11 {offsets = [0, 56], sizes = [16, 8], strides = [1, 1]} : vector<16x96xf32> to vector<16x8xf32>
    %87 = vector.extract_strided_slice %11 {offsets = [0, 88], sizes = [16, 8], strides = [1, 1]} : vector<16x96xf32> to vector<16x8xf32>
    %88 = tpu.transpose %86, [1, 0] : vector<16x8xf32> -> vector<8x16xf32>
    %cst_32 = arith.constant dense<0.000000e+00> : vector<16x16xf32>
    %89 = tpu.matmul %85, %88, %cst_32 {dimension_numbers = #tpu.dot_dimension_numbers<[1], [0], [0], [1], [0, 0, 1, 1], [], []>} : vector<16x8xf32>, vector<8x16xf32>, vector<16x16xf32> -> vector<16x16xf32>
    %cst_33 = arith.constant 0.353553385 : f32
    %90 = vector.broadcast %cst_33 : f32 to vector<16x16xf32>
    %91 = arith.mulf %89, %90 : vector<16x16xf32>
    %92 = arith.addf %91, %12 : vector<16x16xf32>
    %cst_34 = arith.constant dense<0xFF800000> : vector<16xf32>
    %93 = vector.multi_reduction <maximumf>, %92, %cst_34 [1] : vector<16x16xf32> to vector<16xf32>
    %94 = vector.shape_cast %93 : vector<16xf32> to vector<16x1xf32>
    %95 = vector.broadcast %94 : vector<16x1xf32> to vector<16x16xf32>
    %96 = arith.subf %92, %95 : vector<16x16xf32>
    %97 = math.exp %96 : vector<16x16xf32>
    %cst_35 = arith.constant dense<0.000000e+00> : vector<16xf32>
    %98 = vector.multi_reduction <add>, %97, %cst_35 [1] : vector<16x16xf32> to vector<16xf32>
    %99 = vector.shape_cast %98 : vector<16xf32> to vector<16x1xf32>
    %100 = tpu.reciprocal %99 {approx = true} : vector<16x1xf32> -> vector<16x1xf32>
    %101 = vector.broadcast %100 : vector<16x1xf32> to vector<16x16xf32>
    %102 = arith.mulf %97, %101 : vector<16x16xf32>
    %cst_36 = arith.constant dense<0.000000e+00> : vector<16x8xf32>
    %103 = tpu.matmul %102, %87, %cst_36 {dimension_numbers = #tpu.dot_dimension_numbers<[1], [0], [0], [1], [0, 0, 1, 1], [], []>} : vector<16x16xf32>, vector<16x8xf32>, vector<16x8xf32> -> vector<16x8xf32>
    %104 = arith.truncf %103 : vector<16x8xf32> to vector<16x8xbf16>
    %105 = vector.extract_strided_slice %14 {offsets = [24, 0], sizes = [8, 32], strides = [1, 1]} : vector<32x32xbf16> to vector<8x32xbf16>
    %cst_37 = arith.constant dense<0.000000e+00> : vector<16x32xf32>
    %106 = tpu.matmul %104, %105, %cst_37 {dimension_numbers = #tpu.dot_dimension_numbers<[1], [0], [0], [1], [0, 0, 1, 1], [], []>} : vector<16x8xbf16>, vector<8x32xbf16>, vector<16x32xf32> -> vector<16x32xf32>
    %107 = arith.addf %84, %106 : vector<16x32xf32>
    %c0_38 = arith.constant 0 : index
    %c0_39 = arith.constant 0 : index
    %c0_40 = arith.constant 0 : index
    %108 = vector.load %arg9[%c0_38, %c0_39, %c0_40] : memref<1x1x32xf32, #tpu.memory_space<vmem>>, vector<1x1x32xf32>
    %109 = vector.shape_cast %108 : vector<1x1x32xf32> to vector<1x32xf32>
    %110 = vector.broadcast %109 : vector<1x32xf32> to vector<16x32xf32>
    %111 = arith.addf %107, %110 : vector<16x32xf32>
    %112 = arith.addf %111, %3 : vector<16x32xf32>
    %c0_41 = arith.constant 0 : index
    %c0_42 = arith.constant 0 : index
    %c0_43 = arith.constant 0 : index
    %113 = vector.load %arg10[%c0_41, %c0_42, %c0_43] : memref<1x1x32xf32, #tpu.memory_space<vmem>>, vector<1x1x32xf32>
    %114 = vector.shape_cast %113 : vector<1x1x32xf32> to vector<1x32xf32>
    %c0_44 = arith.constant 0 : index
    %c0_45 = arith.constant 0 : index
    %c0_46 = arith.constant 0 : index
    %115 = vector.load %arg11[%c0_44, %c0_45, %c0_46] : memref<1x1x32xf32, #tpu.memory_space<vmem>>, vector<1x1x32xf32>
    %116 = vector.shape_cast %115 : vector<1x1x32xf32> to vector<1x32xf32>
    %cst_47 = arith.constant dense<0.000000e+00> : vector<16xf32>
    %117 = vector.multi_reduction <add>, %112, %cst_47 [1] : vector<16x32xf32> to vector<16xf32>
    %118 = vector.shape_cast %117 : vector<16xf32> to vector<16x1xf32>
    %cst_48 = arith.constant 3.200000e+01 : f32
    %119 = vector.broadcast %cst_48 : f32 to vector<16x1xf32>
    %120 = arith.divf %118, %119 : vector<16x1xf32>
    %121 = vector.broadcast %120 : vector<16x1xf32> to vector<16x32xf32>
    %122 = arith.subf %112, %121 : vector<16x32xf32>
    %123 = arith.mulf %122, %122 : vector<16x32xf32>
    %cst_49 = arith.constant dense<0.000000e+00> : vector<16xf32>
    %124 = vector.multi_reduction <add>, %123, %cst_49 [1] : vector<16x32xf32> to vector<16xf32>
    %125 = vector.shape_cast %124 : vector<16xf32> to vector<16x1xf32>
    %cst_50 = arith.constant 3.200000e+01 : f32
    %126 = vector.broadcast %cst_50 : f32 to vector<16x1xf32>
    %127 = arith.divf %125, %126 : vector<16x1xf32>
    %128 = vector.broadcast %120 : vector<16x1xf32> to vector<16x32xf32>
    %129 = arith.subf %112, %128 : vector<16x32xf32>
    %cst_51 = arith.constant 9.99999996E-13 : f32
    %130 = vector.broadcast %cst_51 : f32 to vector<16x1xf32>
    %131 = arith.addf %127, %130 : vector<16x1xf32>
    %132 = math.rsqrt %131 : vector<16x1xf32>
    %133 = vector.broadcast %132 : vector<16x1xf32> to vector<16x32xf32>
    %134 = arith.mulf %129, %133 : vector<16x32xf32>
    %135 = vector.broadcast %114 : vector<1x32xf32> to vector<16x32xf32>
    %136 = arith.mulf %134, %135 : vector<16x32xf32>
    %137 = vector.broadcast %116 : vector<1x32xf32> to vector<16x32xf32>
    %138 = arith.addf %136, %137 : vector<16x32xf32>
    %139 = arith.truncf %138 : vector<16x32xf32> to vector<16x32xbf16>
    %c0_52 = arith.constant 0 : index
    %c0_53 = arith.constant 0 : index
    %c0_54 = arith.constant 0 : index
    %140 = vector.load %arg12[%c0_52, %c0_53, %c0_54] : memref<1x32x64xbf16, #tpu.memory_space<vmem>>, vector<1x32x64xbf16>
    %141 = vector.shape_cast %140 : vector<1x32x64xbf16> to vector<32x64xbf16>
    %cst_55 = arith.constant dense<0.000000e+00> : vector<16x64xf32>
    %142 = tpu.matmul %139, %141, %cst_55 {dimension_numbers = #tpu.dot_dimension_numbers<[1], [0], [0], [1], [0, 0, 1, 1], [], []>} : vector<16x32xbf16>, vector<32x64xbf16>, vector<16x64xf32> -> vector<16x64xf32>
    %c0_56 = arith.constant 0 : index
    %c0_57 = arith.constant 0 : index
    %c0_58 = arith.constant 0 : index
    %143 = vector.load %arg13[%c0_56, %c0_57, %c0_58] : memref<1x1x64xf32, #tpu.memory_space<vmem>>, vector<1x1x64xf32>
    %144 = vector.shape_cast %143 : vector<1x1x64xf32> to vector<1x64xf32>
    %145 = vector.broadcast %144 : vector<1x64xf32> to vector<16x64xf32>
    %146 = arith.addf %142, %145 : vector<16x64xf32>
    %147 = arith.mulf %146, %146 : vector<16x64xf32>
    %148 = arith.mulf %146, %147 : vector<16x64xf32>
    %cst_59 = arith.constant 4.471500e-02 : f32
    %149 = vector.broadcast %cst_59 : f32 to vector<16x64xf32>
    %150 = arith.mulf %149, %148 : vector<16x64xf32>
    %151 = arith.addf %146, %150 : vector<16x64xf32>
    %cst_60 = arith.constant 0.797884583 : f32
    %152 = vector.broadcast %cst_60 : f32 to vector<16x64xf32>
    %153 = arith.mulf %152, %151 : vector<16x64xf32>
    %154 = math.tanh %153 : vector<16x64xf32>
    %cst_61 = arith.constant 1.000000e+00 : f32
    %155 = vector.broadcast %cst_61 : f32 to vector<16x64xf32>
    %156 = arith.addf %155, %154 : vector<16x64xf32>
    %cst_62 = arith.constant 5.000000e-01 : f32
    %157 = vector.broadcast %cst_62 : f32 to vector<16x64xf32>
    %158 = arith.mulf %157, %156 : vector<16x64xf32>
    %159 = arith.mulf %146, %158 : vector<16x64xf32>
    %160 = arith.truncf %159 : vector<16x64xf32> to vector<16x64xbf16>
    %c0_63 = arith.constant 0 : index
    %c0_64 = arith.constant 0 : index
    %c0_65 = arith.constant 0 : index
    %161 = vector.load %arg14[%c0_63, %c0_64, %c0_65] : memref<1x64x32xbf16, #tpu.memory_space<vmem>>, vector<1x64x32xbf16>
    %162 = vector.shape_cast %161 : vector<1x64x32xbf16> to vector<64x32xbf16>
    %cst_66 = arith.constant dense<0.000000e+00> : vector<16x32xf32>
    %163 = tpu.matmul %160, %162, %cst_66 {dimension_numbers = #tpu.dot_dimension_numbers<[1], [0], [0], [1], [0, 0, 1, 1], [], []>} : vector<16x64xbf16>, vector<64x32xbf16>, vector<16x32xf32> -> vector<16x32xf32>
    %c0_67 = arith.constant 0 : index
    %c0_68 = arith.constant 0 : index
    %c0_69 = arith.constant 0 : index
    %164 = vector.load %arg15[%c0_67, %c0_68, %c0_69] : memref<1x1x32xf32, #tpu.memory_space<vmem>>, vector<1x1x32xf32>
    %165 = vector.shape_cast %164 : vector<1x1x32xf32> to vector<1x32xf32>
    %166 = vector.broadcast %165 : vector<1x32xf32> to vector<16x32xf32>
    %167 = arith.addf %163, %166 : vector<16x32xf32>
    %168 = arith.addf %167, %138 : vector<16x32xf32>
    %c0_70 = arith.constant 0 : index
    %c0_71 = arith.constant 0 : index
    %c0_72 = arith.constant 0 : index
    %169 = vector.load %arg16[%c0_70, %c0_71, %c0_72] : memref<1x1x32xf32, #tpu.memory_space<vmem>>, vector<1x1x32xf32>
    %170 = vector.shape_cast %169 : vector<1x1x32xf32> to vector<1x32xf32>
    %c0_73 = arith.constant 0 : index
    %c0_74 = arith.constant 0 : index
    %c0_75 = arith.constant 0 : index
    %171 = vector.load %arg17[%c0_73, %c0_74, %c0_75] : memref<1x1x32xf32, #tpu.memory_space<vmem>>, vector<1x1x32xf32>
    %172 = vector.shape_cast %171 : vector<1x1x32xf32> to vector<1x32xf32>
    %cst_76 = arith.constant dense<0.000000e+00> : vector<16xf32>
    %173 = vector.multi_reduction <add>, %168, %cst_76 [1] : vector<16x32xf32> to vector<16xf32>
    %174 = vector.shape_cast %173 : vector<16xf32> to vector<16x1xf32>
    %cst_77 = arith.constant 3.200000e+01 : f32
    %175 = vector.broadcast %cst_77 : f32 to vector<16x1xf32>
    %176 = arith.divf %174, %175 : vector<16x1xf32>
    %177 = vector.broadcast %176 : vector<16x1xf32> to vector<16x32xf32>
    %178 = arith.subf %168, %177 : vector<16x32xf32>
    %179 = arith.mulf %178, %178 : vector<16x32xf32>
    %cst_78 = arith.constant dense<0.000000e+00> : vector<16xf32>
    %180 = vector.multi_reduction <add>, %179, %cst_78 [1] : vector<16x32xf32> to vector<16xf32>
    %181 = vector.shape_cast %180 : vector<16xf32> to vector<16x1xf32>
    %cst_79 = arith.constant 3.200000e+01 : f32
    %182 = vector.broadcast %cst_79 : f32 to vector<16x1xf32>
    %183 = arith.divf %181, %182 : vector<16x1xf32>
    %184 = vector.broadcast %176 : vector<16x1xf32> to vector<16x32xf32>
    %185 = arith.subf %168, %184 : vector<16x32xf32>
    %cst_80 = arith.constant 9.99999996E-13 : f32
    %186 = vector.broadcast %cst_80 : f32 to vector<16x1xf32>
    %187 = arith.addf %183, %186 : vector<16x1xf32>
    %188 = math.rsqrt %187 : vector<16x1xf32>
    %189 = vector.broadcast %188 : vector<16x1xf32> to vector<16x32xf32>
    %190 = arith.mulf %185, %189 : vector<16x32xf32>
    %191 = vector.broadcast %170 : vector<1x32xf32> to vector<16x32xf32>
    %192 = arith.mulf %190, %191 : vector<16x32xf32>
    %193 = vector.broadcast %172 : vector<1x32xf32> to vector<16x32xf32>
    %194 = arith.addf %192, %193 : vector<16x32xf32>
    %c0_81 = arith.constant 0 : index
    %c0_82 = arith.constant 0 : index
    %195 = vector.load %arg23[%c0_81, %c0_82] : memref<16x32xf32, #tpu.memory_space<vmem>>, vector<16x32xf32>
    tpu.vector_store %arg23[%c0_81, %c0_82], %194 {strides = array<i32>} : memref<16x32xf32, #tpu.memory_space<vmem>>, vector<16x32xf32>,
    %c1_i32 = arith.constant 1 : i32
    %196 = arith.cmpi eq, %arg0, %c1_i32 : i32
    %197 = arith.extui %196 : i1 to i32
    %c0_i32_83 = arith.constant 0 : i32
    %198 = arith.cmpi ne, %197, %c0_i32_83 : i32
    scf.if %198 {
      %c0_84 = arith.constant 0 : index
      %c0_85 = arith.constant 0 : index
      %199 = vector.load %arg3[%c0_84, %c0_85] : memref<2x16xf32, #tpu.memory_space<vmem>>, vector<2x16xf32>
      %cst_86 = arith.constant dense<0.000000e+00> : vector<2x32xf32>
      %200 = tpu.matmul %199, %194, %cst_86 {dimension_numbers = #tpu.dot_dimension_numbers<[1], [0], [0], [1], [0, 0, 1, 1], [], []>} : vector<2x16xf32>, vector<16x32xf32>, vector<2x32xf32> -> vector<2x32xf32>
      %201 = arith.truncf %200 : vector<2x32xf32> to vector<2x32xbf16>
      %c0_87 = arith.constant 0 : index
      %c0_88 = arith.constant 0 : index
      %202 = vector.load %arg18[%c0_87, %c0_88] : memref<32x32xbf16, #tpu.memory_space<vmem>>, vector<32x32xbf16>
      %cst_89 = arith.constant dense<0.000000e+00> : vector<2x32xf32>
      %203 = tpu.matmul %201, %202, %cst_89 {dimension_numbers = #tpu.dot_dimension_numbers<[1], [0], [0], [1], [0, 0, 1, 1], [], []>} : vector<2x32xbf16>, vector<32x32xbf16>, vector<2x32xf32> -> vector<2x32xf32>
      %c0_90 = arith.constant 0 : index
      %c0_91 = arith.constant 0 : index
      %204 = vector.load %arg19[%c0_90, %c0_91] : memref<1x32xf32, #tpu.memory_space<vmem>>, vector<1x32xf32>
      %205 = vector.broadcast %204 : vector<1x32xf32> to vector<2x32xf32>
      %206 = arith.addf %203, %205 : vector<2x32xf32>
      %207 = math.tanh %206 : vector<2x32xf32>
      %208 = arith.truncf %207 : vector<2x32xf32> to vector<2x32xbf16>
      %c0_92 = arith.constant 0 : index
      %c0_93 = arith.constant 0 : index
      %209 = vector.load %arg20[%c0_92, %c0_93] : memref<32x32xbf16, #tpu.memory_space<vmem>>, vector<32x32xbf16>
      %cst_94 = arith.constant dense<0.000000e+00> : vector<2x32xf32>
      %210 = tpu.matmul %208, %209, %cst_94 {dimension_numbers = #tpu.dot_dimension_numbers<[1], [0], [0], [1], [0, 0, 1, 1], [], []>} : vector<2x32xbf16>, vector<32x32xbf16>, vector<2x32xf32> -> vector<2x32xf32>
      %c0_95 = arith.constant 0 : index
      %c0_96 = arith.constant 0 : index
      %211 = vector.load %arg21[%c0_95, %c0_96] : memref<1x32xf32, #tpu.memory_space<vmem>>, vector<1x32xf32>
      %212 = vector.broadcast %211 : vector<1x32xf32> to vector<2x32xf32>
      %213 = arith.addf %210, %212 : vector<2x32xf32>
      %c0_97 = arith.constant 0 : index
      %c0_98 = arith.constant 0 : index
      %214 = vector.load %arg22[%c0_97, %c0_98] : memref<2x32xf32, #tpu.memory_space<vmem>>, vector<2x32xf32>
      tpu.vector_store %arg22[%c0_97, %c0_98], %213 {strides = array<i32>} : memref<2x32xf32, #tpu.memory_space<vmem>>, vector<2x32xf32>,
    } else {
    }
    return
  }
  func.func @transform_0(%arg0: i32) -> (i32, i32) {
    %c0_i32 = arith.constant 0 : i32
    %c0_i32_0 = arith.constant 0 : i32
    %c0_i32_1 = arith.constant 0 : i32
    return %c0_i32, %c0_i32_0 : i32, i32
  }
  func.func @transform_1(%arg0: i32) -> (i32, i32) {
    %c0_i32 = arith.constant 0 : i32
    %c0_i32_0 = arith.constant 0 : i32
    %c0_i32_1 = arith.constant 0 : i32
    return %c0_i32, %c0_i32_0 : i32, i32
  }
  func.func @transform_2(%arg0: i32) -> (i32, i32) {
    %c0_i32 = arith.constant 0 : i32
    %c0_i32_0 = arith.constant 0 : i32
    %c0_i32_1 = arith.constant 0 : i32
    return %c0_i32, %c0_i32_0 : i32, i32
  }
  func.func @transform_3(%arg0: i32) -> (i32, i32) {
    %c0_i32 = arith.constant 0 : i32
    %c0_i32_0 = arith.constant 0 : i32
    %c0_i32_1 = arith.constant 0 : i32
    return %c0_i32, %c0_i32_0 : i32, i32
  }
  func.func @transform_4(%arg0: i32) -> (i32, i32) {
    %c0_i32 = arith.constant 0 : i32
    %c0_i32_0 = arith.constant 0 : i32
    %c0_i32_1 = arith.constant 0 : i32
    return %c0_i32, %c0_i32_0 : i32, i32
  }
  func.func @transform_5(%arg0: i32) -> (i32, i32, i32) {
    %c0_i32 = arith.constant 0 : i32
    %c0_i32_0 = arith.constant 0 : i32
    %c0_i32_1 = arith.constant 0 : i32
    return %arg0, %c0_i32, %c0_i32_0 : i32, i32, i32
  }
  func.func @transform_6(%arg0: i32) -> (i32, i32, i32) {
    %c0_i32 = arith.constant 0 : i32
    %c0_i32_0 = arith.constant 0 : i32
    %c0_i32_1 = arith.constant 0 : i32
    return %arg0, %c0_i32, %c0_i32_0 : i32, i32, i32
  }
  func.func @transform_7(%arg0: i32) -> (i32, i32, i32) {
    %c0_i32 = arith.constant 0 : i32
    %c0_i32_0 = arith.constant 0 : i32
    %c0_i32_1 = arith.constant 0 : i32
    return %arg0, %c0_i32, %c0_i32_0 : i32, i32, i32
  }
  func.func @transform_8(%arg0: i32) -> (i32, i32, i32) {
    %c0_i32 = arith.constant 0 : i32
    %c0_i32_0 = arith.constant 0 : i32
    %c0_i32_1 = arith.constant 0 : i32
    return %arg0, %c0_i32, %c0_i32_0 : i32, i32, i32
  }
  func.func @transform_9(%arg0: i32) -> (i32, i32, i32) {
    %c0_i32 = arith.constant 0 : i32
    %c0_i32_0 = arith.constant 0 : i32
    %c0_i32_1 = arith.constant 0 : i32
    return %arg0, %c0_i32, %c0_i32_0 : i32, i32, i32
  }
  func.func @transform_10(%arg0: i32) -> (i32, i32, i32) {
    %c0_i32 = arith.constant 0 : i32
    %c0_i32_0 = arith.constant 0 : i32
    %c0_i32_1 = arith.constant 0 : i32
    return %arg0, %c0_i32, %c0_i32_0 : i32, i32, i32
  }
  func.func @transform_11(%arg0: i32) -> (i32, i32, i32) {
    %c0_i32 = arith.constant 0 : i32
    %c0_i32_0 = arith.constant 0 : i32
    %c0_i32_1 = arith.constant 0 : i32
    return %arg0, %c0_i32, %c0_i32_0 : i32, i32, i32
  }
  func.func @transform_12(%arg0: i32) -> (i32, i32, i32) {
    %c0_i32 = arith.constant 0 : i32
    %c0_i32_0 = arith.constant 0 : i32
    %c0_i32_1 = arith.constant 0 : i32
    return %arg0, %c0_i32, %c0_i32_0 : i32, i32, i32
  }
  func.func @transform_13(%arg0: i32) -> (i32, i32, i32) {
    %c0_i32 = arith.constant 0 : i32
    %c0_i32_0 = arith.constant 0 : i32
    %c0_i32_1 = arith.constant 0 : i32
    return %arg0, %c0_i32, %c0_i32_0 : i32, i32, i32
  }
  func.func @transform_14(%arg0: i32) -> (i32, i32, i32) {
    %c0_i32 = arith.constant 0 : i32
    %c0_i32_0 = arith.constant 0 : i32
    %c0_i32_1 = arith.constant 0 : i32
    return %arg0, %c0_i32, %c0_i32_0 : i32, i32, i32
  }
  func.func @transform_15(%arg0: i32) -> (i32, i32, i32) {
    %c0_i32 = arith.constant 0 : i32
    %c0_i32_0 = arith.constant 0 : i32
    %c0_i32_1 = arith.constant 0 : i32
    return %arg0, %c0_i32, %c0_i32_0 : i32, i32, i32
  }
  func.func @transform_16(%arg0: i32) -> (i32, i32, i32) {
    %c0_i32 = arith.constant 0 : i32
    %c0_i32_0 = arith.constant 0 : i32
    %c0_i32_1 = arith.constant 0 : i32
    return %arg0, %c0_i32, %c0_i32_0 : i32, i32, i32
  }
  func.func @transform_17(%arg0: i32) -> (i32, i32) {
    %c0_i32 = arith.constant 0 : i32
    %c0_i32_0 = arith.constant 0 : i32
    %c0_i32_1 = arith.constant 0 : i32
    return %c0_i32, %c0_i32_0 : i32, i32
  }
  func.func @transform_18(%arg0: i32) -> (i32, i32) {
    %c0_i32 = arith.constant 0 : i32
    %c0_i32_0 = arith.constant 0 : i32
    %c0_i32_1 = arith.constant 0 : i32
    return %c0_i32, %c0_i32_0 : i32, i32
  }
  func.func @transform_19(%arg0: i32) -> (i32, i32) {
    %c0_i32 = arith.constant 0 : i32
    %c0_i32_0 = arith.constant 0 : i32
    %c0_i32_1 = arith.constant 0 : i32
    return %c0_i32, %c0_i32_0 : i32, i32
  }
  func.func @transform_20(%arg0: i32) -> (i32, i32) {
    %c0_i32 = arith.constant 0 : i32
    %c0_i32_0 = arith.constant 0 : i32
    %c0_i32_1 = arith.constant 0 : i32
    return %c0_i32, %c0_i32_0 : i32, i32
  }
  func.func @transform_21(%arg0: i32) -> (i32, i32) {
    %c0_i32 = arith.constant 0 : i32
    %c0_i32_0 = arith.constant 0 : i32
    %c0_i32_1 = arith.constant 0 : i32
    return %c0_i32, %c0_i32_0 : i32, i32
  }
}

</mosaic_0001>

<bundles_post_ra>
// kernel: biencoder_forward.2
= control target key start
LH: loop header
LB: loop body
LE: loop exit
PB: predicated region body
PF: predicated region fallthrough
CT: control target
= control target key end

     0   :  { %s2630_s0 = inlined_call_operand.vmem [shape: f32[16,32], index: 0, kind: input, shape index: {}]   ;;  %s2631_s1 = inlined_call_operand.vmem [shape: f32[16,16], index: 1, kind: input, shape index: {}]   ;;  %s2632_s2 = inlined_call_operand.vmem [shape: f32[2,16], index: 2, kind: input, shape index: {}]   ;;  %s2633_s3 = inlined_call_operand.vmem [shape: f32[1,32], index: 3, kind: input, shape index: {}]   ;;  %s2634_s4 = inlined_call_operand.vmem [shape: f32[1,32], index: 4, kind: input, shape index: {}]   ;;  %s2635_s5 = inlined_call_operand.vmem [shape: bf16[2,32,96], index: 5, kind: input, shape index: {}]   ;;  %s2636_s6 = inlined_call_operand.vmem [shape: f32[2,1,96], index: 6, kind: input, shape index: {}]   ;;  %s2637_s7 = inlined_call_operand.vmem [shape: bf16[2,32,32], index: 7, kind: input, shape index: {}]   ;;  %s2638_s8 = inlined_call_operand.vmem [shape: f32[2,1,32], index: 8, kind: input, shape index: {}]   ;;  %s2639_s9 = inlined_call_operand.vmem [shape: f32[2,1,32], index: 9, kind: input, shape index: {}]   ;;  %s2640_s10 = inlined_call_operand.vmem [shape: f32[2,1,32], index: 10, kind: input, shape index: {}]   ;;  %s2641_s11 = inlined_call_operand.vmem [shape: bf16[2,32,64], index: 11, kind: input, shape index: {}]   ;;  %s2642_s12 = inlined_call_operand.vmem [shape: f32[2,1,64], index: 12, kind: input, shape index: {}]   ;;  %s2643_s13 = inlined_call_operand.vmem [shape: bf16[2,64,32], index: 13, kind: input, shape index: {}]   ;;  %s2644_s14 = inlined_call_operand.vmem [shape: f32[2,1,32], index: 14, kind: input, shape index: {}]   ;;  %s2645_s15 = inlined_call_operand.vmem [shape: f32[2,1,32], index: 15, kind: input, shape index: {}]   ;;  %s2646_s16 = inlined_call_operand.vmem [shape: f32[2,1,32], index: 16, kind: input, shape index: {}]   ;;  %s2647_s17 = inlined_call_operand.vmem [shape: bf16[32,32], index: 17, kind: input, shape index: {}]   ;;  %s2648_s18 = inlined_call_operand.vmem [shape: f32[1,32], index: 18, kind: input, shape index: {}]   ;;  %s2649_s19 = inlined_call_operand.vmem [shape: bf16[32,32], index: 19, kind: input, shape index: {}]   ;;  %s2650_s20 = inlined_call_operand.vmem [shape: f32[1,32], index: 20, kind: input, shape index: {}]   ;;  %s2651_s21 = inlined_call_operand.hbm [shape: f32[2,32], index: 21, kind: output, shape index: {}]  }
   0x1   :  { %2657 = sst [smem:[#allocation7_spill]] %s2630_s0 }
   0x2   :  { %2658 = sst [smem:[#allocation8_spill]] %s2631_s1 }
   0x3   :  { %2659 = sst [smem:[#allocation9_spill]] %s2632_s2 }
   0x4   :  { %2660 = sst [smem:[#allocation10_spill]] %s2633_s3 }
   0x5   :  { %2661 = sst [smem:[#allocation11_spill]] %s2634_s4 }
   0x6   :  { %2662 = sst [smem:[#allocation12_spill]] %s2635_s5 }
   0x7   :  { %2663 = sst [smem:[#allocation13_spill]] %s2637_s7 }
   0x8   :  { %2664 = sst [smem:[#allocation14_spill]] %s2647_s17 }
   0x9   :  { %2665 = sst [smem:[#allocation15_spill]] %s2648_s18 }
   0xa   :  { %2666 = sst [smem:[#allocation16_spill]] %s2649_s19 }
   0xb   :  { %2667 = sst [smem:[#allocation17_spill]] %s2650_s20 }
   0xc   :  { %2668 = sst [smem:[#allocation18_spill]] %s2651_s21 }
   0xd   :  { %26 = vsyncpa [#allocation4], 0  ;;  %s2321_s2 = smov 0  }
   0xe LB: > { %2669 = sst [smem:[#allocation6_spill]] %s2195_s2  ;;  %s2327_s25 = sadd.s32 4294967295, %s2195_s2   ;;  %s2195_s2 = sphi %s2321_s2, %s32_s2  }
   0xf   : > { %p1930_p0 = scmp.ge.s32.totalorder %s2195_s2, 1  ;;  %p677_p1 = scmp.lt.s32.totalorder %s2195_s2, 3 }
  0x11   : > { %p678_p2 = pnand %p1930_p0, %p677_p1 }
  0x12   : > { %p771_p3 = scmp.lt.s32.totalorder (!%p678_p2), %s2327_s25, 1  ;;  %s2670_s30 = sld [smem:[#allocation12_spill]] (!%p678_p2) }
  0x13   : > { %681 = sbr.rel (%p678_p2) target bundleno = 3080 (0xc08), region = 104  ;;  %s2671_s7 = sld [smem:[#allocation13_spill]] (!%p678_p2) }
  0x14   : > { %p1939_p4 = scmp.ne.s32.totalorder (!%p678_p2), %s2327_s25, 0 }
  0x18   : > { %s2333_s26 = scalar_select %p771_p3, %s2327_s25, 1 }
  0x19   : > { %s2672_s2 = sld [smem:[#allocation7_spill]] (!%p1939_p4) }
  0x1a   : > { %s2027_s27 = sshll.u32 %s2333_s26, 4  ;;  %s2030_s17 = sshll.u32 %s2333_s26, 5 }
  0x1b   : > { %s2343_s5 = scalar_lea.vmem %s2670_s30, %s2027_s27  ;;  %s2348_s1 = scalar_lea.vmem %s2671_s7, %s2027_s27 }
  0x1c   : > { %s2365_s30 = scalar_lea.vmem %s2641_s11, %s2027_s27  ;;  %s800_s7 = scalar_lea.vmem %s2642_s12, %s2333_s26 }
  0x1d   : > { %s2375_s21 = scalar_lea.vmem %s2643_s13, %s2030_s17  ;;  %s808_s3 = scalar_lea.vmem %s2644_s14, %s2333_s26 }
  0x1e   : > { %s811_s0 = scalar_lea.vmem %s2645_s15, %s2333_s26  ;;  %s814_s19 = scalar_lea.vmem %s2646_s16, %s2333_s26 }
  0x1f   : > { %819 = sbr.rel (%p1939_p4) target bundleno = 314 (0x13a), region = 108  ;;  %s2673_s24 = smov (!%p1939_p4), %s2672_s2 }
  0x20   : > { %s2674_s28 = sld [smem:[#allocation10_spill]] (!%p1939_p4) }
  0x21   : > { %s2675_s22 = sld [smem:[#allocation11_spill]] (!%p1939_p4) }
  0x24   : > { %v820_v0 = vld [vmem:[%s2672_s2] sm:$0xff]  ;;  %vm824_vm0 = vcmask 261120   ;;  %v821_v2 = vld [vmem:[%s2673_s24 + $0x8] sm:$0xff]  ;;  %v2197_v4 = vmov 32.0  }
  0x25   : > { %v825_v1 = vsel %vm824_vm0, %v820_v0, 0.0  ;;  %v828_v3 = vsel %vm824_vm0, %v821_v2, 0.0  ;;  %2073 = vrcp.f32 %v2197_v4 }
  0x26   : > { %826 = vadd.xlane.f32.xlu0 %v825_v1  ;;  %v2071_v35 = vld [vmem:[%s2674_s28] ss:$0 sm:$0xff] }
  0x27   : > { %v2072_v38 = vld [vmem:[%s2675_s22] ss:$0 sm:$0xff] }
  0x2b   : > { %v2074_v5 = vpop.eup %2073 }
  0x2c   : > { %v832_v6 = vmul.f32 32.0, %v2074_v5  ;;  %vm836_vm1 = vweird.f32 %v2074_v5 }
  0x2e   : > { %829 = vadd.xlane.f32.xlu0 %v828_v3  ;;  %v833_v7 = vsub.f32 1.0, %v832_v6 }
  0x30   : > { %v834_v8 = vmul.f32 %v2074_v5, %v833_v7 }
  0x32   : > { %v835_v9 = vadd.f32 %v2074_v5, %v834_v8 }
  0x34   : > { %v837_v10 = vsel %vm836_vm1, %v2074_v5, %v835_v9 }
  0x99   : > { %v827_v11 = vpop.xlane.xlu0 %826 }
  0x9a   : > { %v838_v12 = vmul.f32 %v837_v10, %v827_v11 }
  0x9c   : > { %v840_v13 = vsub.f32 %v820_v0, %v838_v12 }
  0x9e   : > { %v842_v14 = vmul.f32 %v840_v13, %v840_v13 }
  0xa0   : > { %v844_v15 = vsel %vm824_vm0, %v842_v14, 0.0 }
  0xa1   : > { %845 = vadd.xlane.f32.xlu1 %v844_v15  ;;  %v830_v16 = vpop.xlane.xlu0 %829 }
  0xa2   : > { %v839_v17 = vmul.f32 %v837_v10, %v830_v16 }
  0xa4   : > { %v841_v18 = vsub.f32 %v821_v2, %v839_v17 }
  0xa6   : > { %v843_v19 = vmul.f32 %v841_v18, %v841_v18 }
  0xa8   : > { %v847_v20 = vsel %vm824_vm0, %v843_v19, 0.0 }
  0xa9   : > { %848 = vadd.xlane.f32.xlu1 %v847_v20 }
 0x114   : > { %v846_v21 = vpop.xlane.xlu1 %845 }
 0x115   : > { %v850_v22 = vmul.f32 %v846_v21, %v837_v10 }
 0x117   : > { %v852_v23 = vadd.f32 1e-12, %v850_v22 }
 0x119   : > { %2075 = vrsqrt.f32 %v852_v23  ;;  %vm860_vm3 = vweird.f32 %v852_v23 }
 0x11c   : > { %v849_v24 = vpop.xlane.xlu1 %848 }
 0x11d   : > { %v851_v25 = vmul.f32 %v849_v24, %v837_v10 }
 0x11f   : > { %v2076_v26 = vpop.eup %2075  ;;  %v853_v27 = vadd.f32 1e-12, %v851_v25 }
 0x120   : > { %v855_v28 = vmul.f32 %v2076_v26, %v852_v23  ;;  %vm861_vm2 = vweird.f32 %v2076_v26 }
 0x121   : > { %2077 = vrsqrt.f32 %v853_v27  ;;  %vm862_vm4 = vmor %vm860_vm3, %vm861_vm2  ;;  %vm870_vm6 = vweird.f32 %v853_v27 }
 0x122   : > { %v856_v29 = vmul.f32 %v2076_v26, %v855_v28 }
 0x124   : > { %v857_v30 = vmul.f32 0.5, %v856_v29 }
 0x126   : > { %v858_v31 = vsub.f32 1.5, %v857_v30 }
 0x127   : > { %v2078_v32 = vpop.eup %2077 }
 0x128   : > { %v859_v33 = vmul.f32 %v2076_v26, %v858_v31  ;;  %v865_v34 = vmul.f32 %v2078_v32, %v853_v27  ;;  %vm871_vm5 = vweird.f32 %v2078_v32 }
 0x129   : > { %vm872_vm7 = vmor %vm870_vm6, %vm871_vm5 }
 0x12a   : > { %v863_v36 = vsel %vm862_vm4, %v2076_v26, %v859_v33  ;;  %v866_v37 = vmul.f32 %v2078_v32, %v865_v34 }
 0x12b   : > { %v874_v39 = vmul.f32 %v863_v36, %v840_v13 }
 0x12c   : > { %v867_v40 = vmul.f32 0.5, %v866_v37 }
 0x12d   : > { %v879_v41 = vmul.f32 %v2071_v35, %v874_v39 }
 0x12e   : > { %v868_v42 = vsub.f32 1.5, %v867_v40 }
 0x12f   : > { %v884_v43 = vadd.f32 %v2072_v38, %v879_v41 }
 0x130   : > { %v869_v44 = vmul.f32 %v2078_v32, %v868_v42 }
 0x131   : > { %886 = vst.msk [vmem:[#allocation2] sm:$0xff] %vm824_vm0, %v884_v43 }
 0x132   : > { %v873_v45 = vsel %vm872_vm7, %v2078_v32, %v869_v44 }
 0x133   : > { %v875_v46 = vmul.f32 %v873_v45, %v841_v18 }
 0x135   : > { %v880_v47 = vmul.f32 %v2071_v35, %v875_v46 }
 0x137   : > { %v885_v48 = vadd.f32 %v2072_v38, %v880_v47 }
 0x139   : > { %887 = vst.msk [vmem:[#allocation2 + $0x8] sm:$0xff] %vm824_vm0, %v885_v48 }
 0x13a PF: > { %v2032_v49 = vld [vmem:[%s2343_s5 + $0x8] sm:$0xff]  ;;  %v2031_v50 = vld [vmem:[%s2343_s5] sm:$0xff]  ;;  %vm911_vm8 = vcmask 261120   ;;  %s2676_s17 = scalar_lea.vmem %s2636_s6, %s2333_s26  ;;  %s2198_s5 = smov 96   ;;  %vm941_vm9 = vcmask 64512   ;;  %vm977_vm10 = vcmask 130048  }
 0x13b   : > { %v2410_v51 = vld [vmem:[#allocation2] sm:$0xff]  ;;  %921 = vmatpush.bf16.msra.mxu0 %v2032_v49  ;;  %s2677_s20 = sld [smem:[#allocation8_spill]]  ;;  %s2199_s4 = smov 88   ;;  %vm1140_vm11 = vcmask 1043456   ;;  %vm1588_vm3 = vcmask 523264  }
 0x13c   : > { %v2099_v55 = vld [vmem:[%s2676_s17] ss:$0 sm:$0xff]  ;;  %s2200_s22 = smov 120   ;;  %s2201_s23 = smov 72  }
 0x13d   : > { %s2202_s2 = smov 112   ;;  %v931_v15 = vld [vmem:[%s2348_s1] sm:$0xf]  ;;  %s2203_s17 = smov 64  }
 0x13e   : > { %v1162_v16 = vsel %vm1140_vm11, %v931_v15, 0  ;;  %s2205_s18 = smov 104   ;;  %s2206_s29 = smov 56  }
 0x13f   : > { %922 = vmatpush.bf16.msra.mxu0 %v2031_v50  ;;  %s2207_s28 = smov 48   ;;  %s2208_s27 = smov 40  }
 0x140   : > { %v2412_v52 = vld [vmem:[#allocation2 + $0x8] sm:$0xff]  ;;  %p2003_p5 = scmp.ne.s32.totalorder %s2327_s25, 1 }
 0x141   : > { %v890_v53 = vpack.c.bf16 %v2412_v52, %v2410_v51  ;;  %v2437_v62 = vld [vmem:[%s2677_s20] sm:$0xff]  ;;  %v2444_v3 = vld [vmem:[%s2677_s20 + $0x8] sm:$0xff] }
 0x143   : > { %1948 = vmatmul.msk.bf16.vlgmr.msra.gmra.mxu0 %vm911_vm8, %v890_v53 }
 0x1c0   : > { %v924_v54 = vpop.f32.mrf.mxu0 }
 0x1c1   : > { %v2425_v58 = vadd.f32 %v2099_v55, %v924_v54 }
 0x1c8   : > { %v926_v56 = vpop.f32.mrf.mxu0 }
 0x1c9   : > { %v2422_v57 = vadd.f32 %v2099_v55, %v926_v56 }
 0x1cb   : > { %939 = vrot.lane.b32.xlu0 %v2422_v57, %s2198_s5  ;;  %v2462_v20 = vpack.i.bf16 %v2425_v58, %v2422_v57 }
 0x1d3   : > { %937 = vrot.lane.b32.xlu0 %v2425_v58, %s2198_s5  ;;  %s2204_s5 = smov 80  }
 0x23d   : > { %v940_v59 = vpop.permute.xlu0 %939 }
 0x23e   : > { %1949 = vmatpush.xpose.msk.msra.mxu1 %vm941_vm9, %v940_v59 }
 0x245   : > { %v938_v60 = vpop.permute.xlu0 %937 }
 0x246   : > { %1950 = vmatpush.xpose.msk.msra.mxu1 %vm941_vm9, %v938_v60 }
 0x249   : > { %1951 = vmatmul.msk.f32.vlgmr.msra.gmra.mxu1 %vm941_vm9, %v2425_v58 }
 0x24a   : > { %1171 = vmatpush.bf16.msrb.mxu1 %v1162_v16 }
 0x251   : > { %1952 = vmatmul.msk.f32.gmra.mxu1 %vm941_vm9, %v2422_v57 }
 0x2c6   : > { %v967_v61 = vpop.f32.mrf.mxu1 }
 0x2c7   : > { %v973_v63 = vmul.f32 0.35355338, %v967_v61 }
 0x2c9   : > { %v975_v0 = vadd.f32 %v973_v63, %v2437_v62 }
 0x2cb   : > { %v978_v1 = vsel %vm977_vm10, %v975_v0, -inf }
 0x2cc   : > { %979 = vmax.xlane.f32.xlu1 %v978_v1 }
 0x2ce   : > { %v970_v2 = vpop.f32.mrf.mxu1 }
 0x2cf   : > { %v974_v4 = vmul.f32 0.35355338, %v970_v2 }
 0x2d1   : > { %v976_v5 = vadd.f32 %v974_v4, %v2444_v3 }
 0x2d3   : > { %v981_v6 = vsel %vm977_vm10, %v976_v5, -inf }
 0x2d4   : > { %982 = vmax.xlane.f32.xlu1 %v981_v6 }
 0x2ed   : > { %1042 = vrot.lane.b32.xlu1 %v2422_v57, %s2199_s4 }
 0x2f5   : > { %1038 = vrot.lane.b32.xlu1 %v2422_v57, %s2200_s22 }
 0x2fd   : > { %1307 = vrot.lane.b32.xlu1 %v2422_v57, %s2201_s23 }
 0x305   : > { %1305 = vrot.lane.b32.xlu1 %v2425_v58, %s2201_s23  ;;  %s2682_s23 = sld [smem:[#allocation14_spill]] (!%p2003_p5) }
 0x30d   : > { %1180 = vrot.lane.b32.xlu1 %v2422_v57, %s2202_s2 }
 0x33f   : > { %v980_v7 = vpop.xlane.xlu1 %979 }
 0x340   : > { %v984_v8 = vsub.f32 %v975_v0, %v980_v7 }
 0x342   : > { %v986_v9 = vmul.f32 1.442695, %v984_v8 }
 0x344   : > { %2107 = vpow2.f32 %v986_v9 }
 0x347   : > { %v983_v10 = vpop.xlane.xlu1 %982 }
 0x348   : > { %v985_v11 = vsub.f32 %v976_v5, %v983_v10 }
 0x34a   : > { %v2108_v12 = vpop.eup %2107  ;;  %v988_v13 = vmul.f32 1.442695, %v985_v11 }
 0x34b   : > { %v990_v14 = vsel %vm977_vm10, %v2108_v12, 0.0 }
 0x34c   : > { %2109 = vpow2.f32 %v988_v13  ;;  %991 = vadd.xlane.f32.xlu2 %v990_v14 }
 0x352   : > { %v2110_v17 = vpop.eup %2109 }
 0x353   : > { %v993_v18 = vsel %vm977_vm10, %v2110_v17, 0.0 }
 0x354   : > { %994 = vadd.xlane.f32.xlu0 %v993_v18 }
 0x35f   : > { %v1043_v19 = vpop.permute.xlu1 %1042 }
 0x360   : > { %1955 = vmatpush.xpose.msk.msra.mxu3 %vm941_vm9, %v1043_v19 }
 0x364   : > { %2080 = vrot.lane.b32.xlu2 %v2462_v20, %s2203_s17 }
 0x367   : > { %v1039_v21 = vpop.permute.xlu1 %1038 }
 0x368   : > { %1178 = vrot.lane.b32.xlu0 %v2425_v58, %s2202_s2  ;;  %s2679_s2 = scalar_lea.vmem %s2639_s9, %s2333_s26 }
 0x36c   : > { %1040 = vrot.lane.b32.xlu2 %v2425_v58, %s2199_s4 }
 0x36f   : > { %v1308_v22 = vpop.permute.xlu1 %1307 }
 0x370   : > { %1970 = vmatpush.xpose.msk.msra.mxu1 %vm941_vm9, %v1308_v22 }
 0x374   : > { %1036 = vrot.lane.b32.xlu2 %v2425_v58, %s2200_s22  ;;  %s2678_s22 = scalar_lea.vmem %s2638_s8, %s2333_s26 }
 0x377   : > { %v1306_v23 = vpop.permute.xlu1 %1305 }
 0x378   : > { %1971 = vmatpush.xpose.msk.msra.mxu1 %vm941_vm9, %v1306_v23 }
 0x37c   : > { %1184 = vrot.lane.b32.xlu2 %v2422_v57, %s2204_s5 }
 0x37f   : > { %v1181_v38 = vpop.permute.xlu1 %1180 }
 0x384   : > { %1182 = vrot.lane.b32.xlu2 %v2425_v58, %s2204_s5 }
 0x38c   : > { %1301 = vrot.lane.b32.xlu2 %v2425_v58, %s2205_s18 }
 0x394   : > { %1303 = vrot.lane.b32.xlu2 %v2422_v57, %s2205_s18  ;;  %s2680_s18 = scalar_lea.vmem %s2640_s10, %s2333_s26 }
 0x3bf   : > { %v992_v24 = vpop.xlane.xlu2 %991 }
 0x3c0   : > { %2111 = vrcp.f32 %v992_v24 }
 0x3c6   : > { %v2112_v27 = vpop.eup %2111 }
 0x3c7   : > { %v2081_v25 = vpop.permute.xlu2 %2080  ;;  %v995_v26 = vpop.xlane.xlu0 %994  ;;  %v998_v30 = vmul.f32 %v2112_v27, %v2108_v12 }
 0x3c8   : > { %v2082_v28 = vunpack.i.l.bf16 %v2081_v25  ;;  %2113 = vrcp.f32 %v995_v26  ;;  %v2083_v29 = vunpack.i.h.bf16 %v2081_v25 }
 0x3ca   : > { %1026 = vmatpush.msra.mxu2 %v2082_v28 }
 0x3cc   : > { %1027 = vmatpush.msra.mxu2 %v2083_v29 }
 0x3cd   : > { %1953 = vmatmul.msk.f32.vlgmr.msra.gmra.mxu2 %vm977_vm10, %v998_v30 }
 0x3ce   : > { %v2114_v32 = vpop.eup %2113 }
 0x3cf   : > { %v1041_v31 = vpop.permute.xlu2 %1040  ;;  %v999_v33 = vmul.f32 %v2114_v32, %v2110_v17 }
 0x3d0   : > { %1956 = vmatpush.xpose.msk.msra.mxu3 %vm941_vm9, %v1041_v31 }
 0x3d5   : > { %1954 = vmatmul.msk.f32.gmra.mxu2 %vm977_vm10, %v999_v33 }
 0x3d7   : > { %v1037_v34 = vpop.permute.xlu2 %1036 }
 0x3d8   : > { %1957 = vmatmul.msk.f32.vlgmr.msra.gmra.mxu3 %vm941_vm9, %v1037_v34 }
 0x3da   : > { %v1179_v37 = vpop.permute.xlu0 %1178 }
 0x3df   : > { %v1185_v35 = vpop.permute.xlu2 %1184 }
 0x3e0   : > { %1958 = vmatmul.msk.f32.gmra.mxu3 %vm941_vm9, %v1039_v21 }
 0x3e1   : > { %1963 = vmatpush.xpose.msk.msrb.mxu3 %vm941_vm9, %v1185_v35 }
 0x3e7   : > { %v1183_v36 = vpop.permute.xlu2 %1182 }
 0x3e8   : > { %1964 = vmatpush.xpose.msk.msrb.mxu3 %vm941_vm9, %v1183_v36 }
 0x3eb   : > { %1965 = vmatmul.msk.f32.vlgmr.msrb.gmra.mxu3 %vm941_vm9, %v1179_v37 }
 0x3ef   : > { %v1302_v49 = vpop.permute.xlu2 %1301 }
 0x3f3   : > { %1966 = vmatmul.msk.f32.gmra.mxu3 %vm941_vm9, %v1181_v38 }
 0x3f7   : > { %v1304_v56 = vpop.permute.xlu2 %1303 }
 0x450   : > { %v1029_v39 = vpop.f32.mrf.mxu2 }
 0x458   : > { %v1032_v40 = vpop.f32.mrf.mxu2 }
 0x459   : > { %v1035_v41 = vpack.c.bf16 %v1032_v40, %v1029_v39 }
 0x45b   : > { %v1069_v42 = vpop.f32.mrf.mxu3  ;;  %1962 = vmatmul.msk.bf16.vlgmr.msrb.gmra.mxu1 %vm941_vm9, %v1035_v41 }
 0x45c   : > { %v1075_v43 = vmul.f32 0.35355338, %v1069_v42 }
 0x45e   : > { %v1077_v44 = vadd.f32 %v1075_v43, %v2437_v62 }
 0x460   : > { %v1079_v45 = vsel %vm977_vm10, %v1077_v44, -inf }
 0x461   : > { %1080 = vmax.xlane.f32.xlu1 %v1079_v45 }
 0x463   : > { %v1072_v46 = vpop.f32.mrf.mxu3 }
 0x464   : > { %v1076_v47 = vmul.f32 0.35355338, %v1072_v46 }
 0x466   : > { %v1078_v48 = vadd.f32 %v1076_v47, %v2444_v3 }
 0x468   : > { %v1082_v50 = vsel %vm977_vm10, %v1078_v48, -inf }
 0x469   : > { %1083 = vmax.xlane.f32.xlu0 %v1082_v50 }
 0x46b   : > { %1972 = vmatmul.msk.f32.vlgmr.msra.gmra.mxu1 %vm941_vm9, %v1302_v49 }
 0x46e   : > { %v1211_v53 = vpop.f32.mrf.mxu3 }
 0x46f   : > { %v1217_v54 = vmul.f32 0.35355338, %v1211_v53 }
 0x471   : > { %v1219_v55 = vadd.f32 %v1217_v54, %v2437_v62 }
 0x473   : > { %1973 = vmatmul.msk.f32.gmra.mxu1 %vm941_vm9, %v1304_v56  ;;  %v1221_v57 = vsel %vm977_vm10, %v1219_v55, -inf }
 0x474   : > { %1222 = vmax.xlane.f32.xlu1 %v1221_v57  ;;  %v932_v57 = vld [vmem:[%s2348_s1 + $0x4] sm:$0xf] }
 0x476   : > { %v1214_v6 = vpop.f32.mrf.mxu3 }
 0x477   : > { %v1218_v9 = vmul.f32 0.35355338, %v1214_v6 }
 0x479   : > { %v1220_v15 = vadd.f32 %v1218_v9, %v2444_v3 }
 0x47b   : > { %v1224_v19 = vsel %vm977_vm10, %v1220_v15, -inf }
 0x4d4   : > { %v1081_v58 = vpop.xlane.xlu1 %1080 }
 0x4d5   : > { %v1085_v59 = vsub.f32 %v1077_v44, %v1081_v58  ;;  %v1142_v58 = vsel %vm1140_vm11, %v932_v57, 0 }
 0x4d6   : > { %1151 = vmatpush.bf16.msrb.mxu0 %v1142_v58 }
 0x4d7   : > { %v1087_v60 = vmul.f32 1.442695, %v1085_v59 }
 0x4d8   : > { %v2494_v61 = vpop.f32.mrf.mxu1 }
 0x4d9   : > { %2115 = vpow2.f32 %v1087_v60 }
 0x4dc   : > { %v1084_v4 = vpop.xlane.xlu0 %1083 }
 0x4dd   : > { %v1086_v8 = vsub.f32 %v1078_v48, %v1084_v4 }
 0x4df   : > { %v2496_v63 = vpop.eup %2115  ;;  %v1089_v11 = vmul.f32 1.442695, %v1086_v8 }
 0x4e0   : > { %v2498_v0 = vpop.f32.mrf.mxu1  ;;  %v1091_v1 = vsel %vm977_vm10, %v2496_v63, 0.0 }
 0x4e1   : > { %1092 = vadd.xlane.f32.xlu1 %v1091_v1  ;;  %2117 = vpow2.f32 %v1089_v11 }
 0x4e7   : > { %v1223_v13 = vpop.xlane.xlu1 %1222  ;;  %v2118_v21 = vpop.eup %2117 }
 0x4e8   : > { %v1334_v2 = vpop.f32.mrf.mxu1  ;;  %v1227_v17 = vsub.f32 %v1219_v55, %v1223_v13  ;;  %v1094_v22 = vsel %vm977_vm10, %v2118_v21, 0.0 }
 0x4e9   : > { %v1340_v5 = vmul.f32 0.35355338, %v1334_v2 }
 0x4eb   : > { %v1342_v7 = vadd.f32 %v1340_v5, %v2437_v62  ;;  %v1229_v62 = vmul.f32 1.442695, %v1227_v17 }
 0x4ed   : > { %v1344_v10 = vsel %vm977_vm10, %v1342_v7, -inf  ;;  %2119 = vpow2.f32 %v1229_v62 }
 0x4ee   : > { %1345 = vmax.xlane.f32.xlu2 %v1344_v10 }
 0x4f0   : > { %v1337_v12 = vpop.f32.mrf.mxu1 }
 0x4f1   : > { %v1341_v14 = vmul.f32 0.35355338, %v1337_v12  ;;  %v933_v12 = vld [vmem:[%s2348_s1 + $0x8] sm:$0xf] }
 0x4f2   : > { %v1283_v13 = vsel %vm1140_vm11, %v933_v12, 0 }
 0x4f3   : > { %v1343_v16 = vadd.f32 %v1341_v14, %v2444_v3  ;;  %v2120_v23 = vpop.eup %2119  ;;  %1292 = vmatpush.bf16.msra.mxu0 %v1283_v13  ;;  %v934_v14 = vld [vmem:[%s2348_s1 + $0xc] sm:$0xf] }
 0x4f4   : > { %v1233_v24 = vsel %vm977_vm10, %v2120_v23, 0.0 }
 0x4f5   : > { %v1347_v18 = vsel %vm977_vm10, %v1343_v16, -inf }
 0x4f6   : > { %1348 = vmax.xlane.f32.xlu0 %v1347_v18  ;;  %1225 = vmax.xlane.f32.xlu2 %v1224_v19 }
 0x4fe   : > { %1095 = vadd.xlane.f32.xlu2 %v1094_v22 }
 0x506   : > { %1234 = vadd.xlane.f32.xlu2 %v1233_v24 }
 0x50a   : > { %2085 = vrot.lane.b32.xlu0 %v2462_v20, %s2206_s29  ;;  %s2683_s29 = sld [smem:[#allocation16_spill]] (!%p2003_p5) }
 0x512   : > { %2095 = vrot.lane.b32.xlu0 %v2462_v20, %s2207_s28 }
 0x554   : > { %v1093_v36 = vpop.xlane.xlu1 %1092 }
 0x561   : > { %v1346_v3 = vpop.xlane.xlu2 %1345 }
 0x562   : > { %v1350_v25 = vsub.f32 %v1342_v7, %v1346_v3 }
 0x564   : > { %v1352_v26 = vmul.f32 1.442695, %v1350_v25 }
 0x566   : > { %2121 = vpow2.f32 %v1352_v26  ;;  %v2100_v26 = vld [vmem:[%s2678_s22] ss:$0 sm:$0xff] }
 0x569   : > { %v1349_v27 = vpop.xlane.xlu0 %1348  ;;  %v1226_v28 = vpop.xlane.xlu2 %1225 }
 0x56a   : > { %v1351_v29 = vsub.f32 %v1343_v16, %v1349_v27  ;;  %v1228_v32 = vsub.f32 %v1220_v15, %v1226_v28  ;;  %v1406_v15 = vsel %vm1140_vm11, %v934_v14, 0  ;;  %v2101_v14 = vld [vmem:[%s2679_s2] ss:$0 sm:$0xff] }
 0x56c   : > { %v2122_v30 = vpop.eup %2121  ;;  %v1354_v31 = vmul.f32 1.442695, %v1351_v29  ;;  %v1231_v34 = vmul.f32 1.442695, %v1228_v32 }
 0x56d   : > { %v1356_v33 = vsel %vm977_vm10, %v2122_v30, 0.0 }
 0x56e   : > { %2123 = vpow2.f32 %v1354_v31  ;;  %1357 = vadd.xlane.f32.xlu1 %v1356_v33 }
 0x56f   : > { %2125 = vpow2.f32 %v1231_v34 }
 0x570   : > { %2127 = vrcp.f32 %v1093_v36 }
 0x571   : > { %v1096_v39 = vpop.xlane.xlu2 %1095 }
 0x572   : > { %2129 = vrcp.f32 %v1096_v39  ;;  %v2209_v39 = vmov 32.0  }
 0x574   : > { %v2124_v35 = vpop.eup %2123 }
 0x575   : > { %v1359_v37 = vsel %vm977_vm10, %v2124_v35, 0.0  ;;  %v2126_v38 = vpop.eup %2125 }
 0x576   : > { %1360 = vadd.xlane.f32.xlu2 %v1359_v37  ;;  %v2128_v41 = vpop.eup %2127  ;;  %v1236_v42 = vsel %vm977_vm10, %v2126_v38, 0.0 }
 0x577   : > { %v1099_v45 = vmul.f32 %v2128_v41, %v2496_v63 }
 0x578   : > { %v2130_v48 = vpop.eup %2129 }
 0x579   : > { %v1235_v46 = vpop.xlane.xlu2 %1234  ;;  %v1100_v53 = vmul.f32 %v2130_v48, %v2118_v21 }
 0x57a   : > { %2131 = vrcp.f32 %v1235_v46 }
 0x57c   : > { %v2086_v40 = vpop.permute.xlu0 %2085 }
 0x57d   : > { %v2087_v43 = vunpack.i.l.bf16 %v2086_v40  ;;  %v2088_v44 = vunpack.i.h.bf16 %v2086_v40 }
 0x57e   : > { %1237 = vadd.xlane.f32.xlu2 %v1236_v42 }
 0x57f   : > { %1127 = vmatpush.msrb.mxu2 %v2087_v43 }
 0x580   : > { %v2132_v54 = vpop.eup %2131 }
 0x581   : > { %1128 = vmatpush.msrb.mxu2 %v2088_v44  ;;  %v1241_v55 = vmul.f32 %v2132_v54, %v2120_v23 }
 0x582   : > { %1959 = vmatmul.msk.f32.vlgmr.msrb.gmra.mxu2 %vm977_vm10, %v1099_v45 }
 0x584   : > { %v2096_v47 = vpop.permute.xlu0 %2095 }
 0x585   : > { %v2097_v49 = vunpack.i.l.bf16 %v2096_v47  ;;  %v2098_v50 = vunpack.i.h.bf16 %v2096_v47 }
 0x587   : > { %1269 = vmatpush.msra.mxu2 %v2097_v49  ;;  %2090 = vrot.lane.b32.xlu1 %v2462_v20, %s2208_s27  ;;  %s2684_s27 = sld [smem:[#allocation15_spill]] (!%p2003_p5) }
 0x589   : > { %1270 = vmatpush.msra.mxu2 %v2098_v50 }
 0x58a   : > { %1960 = vmatmul.msk.f32.gmra.mxu2 %vm977_vm10, %v1100_v53 }
 0x58b   : > { %1415 = vmatpush.bf16.msrb.mxu2 %v1406_v15 }
 0x592   : > { %1967 = vmatmul.msk.f32.vlgmr.msra.gmra.mxu2 %vm977_vm10, %v1241_v55  ;;  %v2034_v55 = vld [vmem:[%s2365_s30 + $0x8] sm:$0xff] }
 0x5e1   : > { %v1358_v59 = vpop.xlane.xlu1 %1357 }
 0x5e9   : > { %v1361_v56 = vpop.xlane.xlu2 %1360 }
 0x5f1   : > { %v1238_v60 = vpop.xlane.xlu2 %1237 }
 0x5f2   : > { %2133 = vrcp.f32 %v1238_v60 }
 0x5f3   : > { %2135 = vrcp.f32 %v1358_v59  ;;  %v2033_v59 = vld [vmem:[%s2365_s30] sm:$0xff] }
 0x5f4   : > { %2137 = vrcp.f32 %v1361_v56 }
 0x5f5   : > { %2139 = vrcp.f32 %v2209_v39 }
 0x5f8   : > { %v2134_v63 = vpop.eup %2133 }
 0x5f9   : > { %v2091_v1 = vpop.permute.xlu1 %2090  ;;  %v1242_v20 = vmul.f32 %v2134_v63, %v2126_v38  ;;  %v2136_v2 = vpop.eup %2135 }
 0x5fa   : > { %v2092_v4 = vunpack.i.l.bf16 %v2091_v1  ;;  %v2093_v5 = vunpack.i.h.bf16 %v2091_v1  ;;  %v1364_v6 = vmul.f32 %v2136_v2, %v2122_v30  ;;  %v2138_v7 = vpop.eup %2137 }
 0x5fb   : > { %1968 = vmatmul.msk.f32.gmra.mxu2 %vm977_vm10, %v1242_v20  ;;  %v1365_v9 = vmul.f32 %v2138_v7, %v2124_v35  ;;  %v2140_v40 = vpop.eup %2139 }
 0x5fc   : > { %1392 = vmatpush.msra.mxu3 %v2092_v4  ;;  %v1441_v41 = vmul.f32 32.0, %v2140_v40  ;;  %vm1445_vm12 = vweird.f32 %v2140_v40 }
 0x5fe   : > { %1393 = vmatpush.msra.mxu3 %v2093_v5  ;;  %v1442_v42 = vsub.f32 1.0, %v1441_v41 }
 0x5ff   : > { %1974 = vmatmul.msk.f32.vlgmr.msra.gmra.mxu3 %vm977_vm10, %v1364_v6 }
 0x605   : > { %v1130_v8 = vpop.f32.mrf.mxu2 }
 0x607   : > { %1975 = vmatmul.msk.f32.gmra.mxu3 %vm977_vm10, %v1365_v9 }
 0x60d   : > { %v1133_v10 = vpop.f32.mrf.mxu2 }
 0x60e   : > { %v1136_v11 = vpack.c.bf16 %v1133_v10, %v1130_v8 }
 0x610   : > { %1961 = vmatmul.msk.bf16.vlgmr.msrb.gmra.mxu0 %vm941_vm9, %v1136_v11 }
 0x611   : > { %1525 = vmatpush.bf16.msrb.mxu0 %v2034_v55 }
 0x615   : > { %v1272_v16 = vpop.f32.mrf.mxu2  ;;  %1526 = vmatpush.bf16.msrb.mxu0 %v2033_v59 }
 0x67e   : > { %v1275_v17 = vpop.f32.mrf.mxu2 }
 0x67f   : > { %v1278_v18 = vpack.c.bf16 %v1275_v17, %v1272_v16 }
 0x681   : > { %1969 = vmatmul.msk.bf16.vlgmr.msra.gmra.mxu0 %vm941_vm9, %v1278_v18  ;;  %v2102_v18 = vld [vmem:[%s2680_s18] ss:$0 sm:$0xff] }
 0x682   : > { %v1395_v19 = vpop.f32.mrf.mxu3 }
 0x68a   : > { %v1398_v62 = vpop.f32.mrf.mxu3 }
 0x68b   : > { %v1401_v21 = vpack.c.bf16 %v1398_v62, %v1395_v19 }
 0x68d   : > { %1976 = vmatmul.msk.bf16.vlgmr.msrb.gmra.mxu2 %vm941_vm9, %v1401_v21  ;;  %v1153_v22 = vpop.f32.mrf.mxu0 }
 0x68e   : > { %v1174_v3 = vadd.f32 %v2494_v61, %v1153_v22 }
 0x695   : > { %v1155_v23 = vpop.f32.mrf.mxu0 }
 0x696   : > { %v1176_v31 = vadd.f32 %v2498_v0, %v1155_v23  ;;  %v1443_v0 = vmul.f32 %v2140_v40, %v1442_v42 }
 0x6fe   : > { %v1294_v24 = vpop.f32.mrf.mxu0 }
 0x6ff   : > { %v1299_v25 = vadd.f32 %v1294_v24, %v1174_v3  ;;  %v2038_v3 = vld [vmem:[%s2375_s21 + $0x18] sm:$0xff] }
 0x700   : > { %1596 = vmatpush.bf16.msrb.mxu1 %v2038_v3  ;;  %v2106_v3 = vld [vmem:[%s814_s19] ss:$0 sm:$0xff]  ;;  %s2685_s19 = sld [smem:[#allocation17_spill]] (!%p2003_p5) }
 0x706   : > { %v1296_v30 = vpop.f32.mrf.mxu0 }
 0x707   : > { %v1300_v33 = vadd.f32 %v1296_v30, %v1176_v31 }
 0x710   : > { %v1417_v27 = vpop.f32.mrf.mxu2 }
 0x711   : > { %v1422_v28 = vadd.f32 %v1417_v27, %v1299_v25  ;;  %v2037_v25 = vld [vmem:[%s2375_s21 + $0x10] sm:$0xff]  ;;  %v2103_v27 = vld [vmem:[%s800_s7] ss:$0 sm:$0xff] }
 0x712   : > { %1597 = vmatpush.bf16.msrb.mxu1 %v2037_v25 }
 0x713   : > { %v1428_v29 = vadd.f32 %v2100_v26, %v1422_v28 }
 0x715   : > { %v1430_v32 = vadd.f32 %v1428_v29, %v2410_v51  ;;  %v1444_v51 = vadd.f32 %v2140_v40, %v1443_v0  ;;  %v2035_v29 = vld [vmem:[%s2375_s21] sm:$0xff] }
 0x717   : > { %v1434_v34 = vsel %vm911_vm8, %v1430_v32, 0.0  ;;  %v2543_v43 = vsel %vm1445_vm12, %v2140_v40, %v1444_v51 }
 0x718   : > { %1435 = vadd.xlane.f32.xlu0 %v1434_v34  ;;  %v1419_v35 = vpop.f32.mrf.mxu2 }
 0x719   : > { %v1423_v61 = vadd.f32 %v1419_v35, %v1300_v33 }
 0x71b   : > { %v1429_v36 = vadd.f32 %v2100_v26, %v1423_v61  ;;  %v2036_v26 = vld [vmem:[%s2375_s21 + $0x8] sm:$0xff] }
 0x71c   : > { %1598 = vmatpush.bf16.msrb.mxu1 %v2036_v26 }
 0x71d   : > { %v1431_v37 = vadd.f32 %v1429_v36, %v2412_v52 }
 0x71f   : > { %v1437_v38 = vsel %vm911_vm8, %v1431_v37, 0.0 }
 0x720   : > { %1438 = vadd.xlane.f32.xlu2 %v1437_v38  ;;  %1599 = vmatpush.bf16.msrb.mxu1 %v2035_v29 }
 0x78b   : > { %v1436_v44 = vpop.xlane.xlu0 %1435 }
 0x78c   : > { %v1447_v45 = vmul.f32 %v2543_v43, %v1436_v44 }
 0x78e   : > { %v1449_v46 = vsub.f32 %v1430_v32, %v1447_v45 }
 0x790   : > { %v1451_v52 = vmul.f32 %v1449_v46, %v1449_v46 }
 0x792   : > { %v1453_v47 = vsel %vm911_vm8, %v1451_v52, 0.0 }
 0x793   : > { %1454 = vadd.xlane.f32.xlu1 %v1453_v47  ;;  %v1439_v48 = vpop.xlane.xlu2 %1438 }
 0x794   : > { %v1448_v49 = vmul.f32 %v2543_v43, %v1439_v48 }
 0x796   : > { %v1450_v50 = vsub.f32 %v1431_v37, %v1448_v49  ;;  %v2104_v49 = vld [vmem:[%s808_s3] ss:$0 sm:$0xff] }
 0x798   : > { %v1452_v53 = vmul.f32 %v1450_v50, %v1450_v50 }
 0x79a   : > { %v1456_v54 = vsel %vm911_vm8, %v1452_v53, 0.0 }
 0x79b   : > { %1457 = vadd.xlane.f32.xlu2 %v1456_v54 }
 0x806   : > { %v1455_v56 = vpop.xlane.xlu1 %1454 }
 0x807   : > { %v1459_v57 = vmul.f32 %v1455_v56, %v2543_v43 }
 0x809   : > { %v1461_v58 = vadd.f32 1e-12, %v1459_v57 }
 0x80b   : > { %2141 = vrsqrt.f32 %v1461_v58  ;;  %vm1469_vm14 = vweird.f32 %v1461_v58 }
 0x80e   : > { %v1458_v60 = vpop.xlane.xlu2 %1457 }
 0x80f   : > { %v1460_v63 = vmul.f32 %v1458_v60, %v2543_v43 }
 0x811   : > { %v2142_v1 = vpop.eup %2141  ;;  %v1462_v20 = vadd.f32 1e-12, %v1460_v63 }
 0x812   : > { %v1464_v2 = vmul.f32 %v2142_v1, %v1461_v58  ;;  %vm1470_vm13 = vweird.f32 %v2142_v1 }
 0x813   : > { %2143 = vrsqrt.f32 %v1462_v20  ;;  %vm1471_vm15 = vmor %vm1469_vm14, %vm1470_vm13  ;;  %vm1479_vm1 = vweird.f32 %v1462_v20 }
 0x814   : > { %v1465_v4 = vmul.f32 %v2142_v1, %v1464_v2 }
 0x816   : > { %v1466_v5 = vmul.f32 0.5, %v1465_v4 }
 0x818   : > { %v1467_v6 = vsub.f32 1.5, %v1466_v5 }
 0x819   : > { %v2144_v7 = vpop.eup %2143 }
 0x81a   : > { %v1468_v8 = vmul.f32 %v2142_v1, %v1467_v6  ;;  %v1474_v9 = vmul.f32 %v2144_v7, %v1462_v20  ;;  %vm1480_vm0 = vweird.f32 %v2144_v7 }
 0x81b   : > { %vm1481_vm2 = vmor %vm1479_vm1, %vm1480_vm0 }
 0x81c   : > { %v1475_v10 = vmul.f32 %v2144_v7, %v1474_v9  ;;  %v1472_v11 = vsel %vm1471_vm15, %v2142_v1, %v1468_v8 }
 0x81d   : > { %v1483_v15 = vmul.f32 %v1472_v11, %v1449_v46 }
 0x81e   : > { %v1476_v12 = vmul.f32 0.5, %v1475_v10 }
 0x81f   : > { %v1488_v19 = vmul.f32 %v2101_v14, %v1483_v15 }
 0x820   : > { %v1477_v13 = vsub.f32 1.5, %v1476_v12 }
 0x821   : > { %v1493_v22 = vadd.f32 %v2102_v18, %v1488_v19 }
 0x822   : > { %v1478_v16 = vmul.f32 %v2144_v7, %v1477_v13 }
 0x824   : > { %v1482_v17 = vsel %vm1481_vm2, %v2144_v7, %v1478_v16 }
 0x825   : > { %v1484_v62 = vmul.f32 %v1482_v17, %v1450_v50 }
 0x827   : > { %v1489_v21 = vmul.f32 %v2101_v14, %v1484_v62 }
 0x829   : > { %v1494_v23 = vadd.f32 %v2102_v18, %v1489_v21 }
 0x82b   : > { %v1495_v24 = vpack.c.bf16 %v1494_v23, %v1493_v22 }
 0x82d   : > { %1985 = vmatmul.msk.bf16.vlgmr.msrb.gmra.mxu0 %vm911_vm8, %v1495_v24 }
 0x8aa   : > { %v1528_v28 = vpop.f32.mrf.mxu0 }
 0x8ab   : > { %v1529_v30 = vadd.f32 %v2103_v27, %v1528_v28 }
 0x8ad   : > { %v1533_v31 = vmul.f32 %v1529_v30, %v1529_v30 }
 0x8af   : > { %v1535_v32 = vmul.f32 %v1533_v31, %v1529_v30 }
 0x8b1   : > { %v1537_v33 = vmul.f32 0.044715, %v1535_v32 }
 0x8b2   : > { %v1530_v34 = vpop.f32.mrf.mxu0 }
 0x8b3   : > { %v1539_v35 = vadd.f32 %v1537_v33, %v1529_v30  ;;  %v1531_v61 = vadd.f32 %v2103_v27, %v1530_v34 }
 0x8b5   : > { %v1541_v36 = vmul.f32 0.7978846, %v1539_v35  ;;  %v1534_v37 = vmul.f32 %v1531_v61, %v1531_v61 }
 0x8b7   : > { %v1536_v38 = vmul.f32 %v1534_v37, %v1531_v61  ;;  %2145 = vtanh.f32 %v1541_v36 }
 0x8b9   : > { %v1538_v39 = vmul.f32 0.044715, %v1536_v38 }
 0x8bb   : > { %v1540_v40 = vadd.f32 %v1538_v39, %v1531_v61 }
 0x8bd   : > { %v1542_v41 = vmul.f32 0.7978846, %v1540_v40  ;;  %v2146_v42 = vpop.eup %2145 }
 0x8be   : > { %v1545_v0 = vadd.f32 1.0, %v2146_v42 }
 0x8bf   : > { %2147 = vtanh.f32 %v1542_v41 }
 0x8c0   : > { %v1547_v44 = vmul.f32 0.5, %v1545_v0 }
 0x8c2   : > { %v1549_v52 = vmul.f32 %v1547_v44, %v1529_v30 }
 0x8c5   : > { %v2148_v51 = vpop.eup %2147 }
 0x8c6   : > { %v1546_v45 = vadd.f32 1.0, %v2148_v51 }
 0x8c8   : > { %v1548_v46 = vmul.f32 0.5, %v1546_v45 }
 0x8ca   : > { %v1550_v47 = vmul.f32 %v1548_v46, %v1531_v61 }
 0x8cc   : > { %v1551_v48 = vpack.c.bf16 %v1550_v47, %v1549_v52 }
 0x8ce   : > { %2002 = vmatmul.msk.bf16.vlgmr.msrb.gmra.mxu1 %vm1588_vm3, %v1551_v48 }
 0x94b   : > { %v1601_v50 = vpop.f32.mrf.mxu1 }
 0x94c   : > { %v1602_v53 = vadd.f32 %v2104_v49, %v1601_v50 }
 0x94e   : > { %v1606_v54 = vadd.f32 %v1602_v53, %v1493_v22 }
 0x950   : > { %v1610_v55 = vsel %vm911_vm8, %v1606_v54, 0.0 }
 0x951   : > { %1611 = vadd.xlane.f32.xlu2 %v1610_v55 }
 0x953   : > { %v1603_v56 = vpop.f32.mrf.mxu1 }
 0x954   : > { %v1604_v57 = vadd.f32 %v2104_v49, %v1603_v56 }
 0x956   : > { %v1607_v58 = vadd.f32 %v1604_v57, %v1494_v23  ;;  %v2105_v23 = vld [vmem:[%s811_s0] ss:$0 sm:$0xff]  ;;  %s2681_s0 = sld [smem:[#allocation9_spill]] (!%p2003_p5) }
 0x958   : > { %v1613_v59 = vsel %vm911_vm8, %v1607_v58, 0.0 }
 0x959   : > { %1614 = vadd.xlane.f32.xlu2 %v1613_v59 }
 0x9c4   : > { %v1612_v60 = vpop.xlane.xlu2 %1611 }
 0x9c5   : > { %v1616_v63 = vmul.f32 %v1612_v60, %v2543_v43 }
 0x9c7   : > { %v1618_v1 = vsub.f32 %v1606_v54, %v1616_v63 }
 0x9c9   : > { %v1620_v20 = vmul.f32 %v1618_v1, %v1618_v1 }
 0x9cb   : > { %v1622_v2 = vsel %vm911_vm8, %v1620_v20, 0.0 }
 0x9cc   : > { %1623 = vadd.xlane.f32.xlu2 %v1622_v2  ;;  %v1615_v4 = vpop.xlane.xlu2 %1614 }
 0x9cd   : > { %v1617_v5 = vmul.f32 %v1615_v4, %v2543_v43 }
 0x9cf   : > { %v1619_v6 = vsub.f32 %v1607_v58, %v1617_v5 }
 0x9d1   : > { %v1621_v7 = vmul.f32 %v1619_v6, %v1619_v6 }
 0x9d3   : > { %v1625_v8 = vsel %vm911_vm8, %v1621_v7, 0.0 }
 0x9d4   : > { %1626 = vadd.xlane.f32.xlu0 %v1625_v8 }
 0xa3f   : > { %v1624_v9 = vpop.xlane.xlu2 %1623 }
 0xa40   : > { %v1628_v10 = vmul.f32 %v1624_v9, %v2543_v43 }
 0xa42   : > { %v1630_v11 = vadd.f32 1e-12, %v1628_v10 }
 0xa44   : > { %2149 = vrsqrt.f32 %v1630_v11  ;;  %vm1638_vm5 = vweird.f32 %v1630_v11 }
 0xa47   : > { %v1627_v12 = vpop.xlane.xlu0 %1626 }
 0xa48   : > { %v1629_v13 = vmul.f32 %v1627_v12, %v2543_v43 }
 0xa4a   : > { %v2150_v14 = vpop.eup %2149  ;;  %v1631_v15 = vadd.f32 1e-12, %v1629_v13 }
 0xa4b   : > { %v1633_v16 = vmul.f32 %v2150_v14, %v1630_v11  ;;  %vm1639_vm4 = vweird.f32 %v2150_v14 }
 0xa4c   : > { %2151 = vrsqrt.f32 %v1631_v15  ;;  %vm1640_vm6 = vmor %vm1638_vm5, %vm1639_vm4  ;;  %vm1648_vm9 = vweird.f32 %v1631_v15 }
 0xa4d   : > { %v1634_v17 = vmul.f32 %v2150_v14, %v1633_v16 }
 0xa4f   : > { %v1635_v18 = vmul.f32 0.5, %v1634_v17 }
 0xa51   : > { %v1636_v19 = vsub.f32 1.5, %v1635_v18 }
 0xa52   : > { %v2152_v62 = vpop.eup %2151 }
 0xa53   : > { %v1637_v21 = vmul.f32 %v2150_v14, %v1636_v19  ;;  %v1643_v22 = vmul.f32 %v2152_v62, %v1631_v15  ;;  %vm1649_vm7 = vweird.f32 %v2152_v62 }
 0xa54   : > { %vm1650_vm11 = vmor %vm1648_vm9, %vm1649_vm7 }
 0xa55   : > { %v1641_v43 = vsel %vm1640_vm6, %v2150_v14, %v1637_v21  ;;  %v1644_v24 = vmul.f32 %v2152_v62, %v1643_v22 }
 0xa56   : > { %v1652_v25 = vmul.f32 %v1641_v43, %v1618_v1 }
 0xa57   : > { %v1645_v26 = vmul.f32 0.5, %v1644_v24 }
 0xa58   : > { %v1657_v27 = vmul.f32 %v2105_v23, %v1652_v25 }
 0xa59   : > { %v1646_v28 = vsub.f32 1.5, %v1645_v26 }
 0xa5a   : > { %v1662_v29 = vadd.f32 %v2106_v3, %v1657_v27 }
 0xa5b   : > { %v1647_v30 = vmul.f32 %v2152_v62, %v1646_v28 }
 0xa5c   : > { %1664 = vst.msk [vmem:[#allocation2] sm:$0xff] %vm911_vm8, %v1662_v29 }
 0xa5d   : > { %v1651_v31 = vsel %vm1650_vm11, %v2152_v62, %v1647_v30 }
 0xa5e   : > { %v1653_v32 = vmul.f32 %v1651_v31, %v1619_v6 }
 0xa60   : > { %v1658_v33 = vmul.f32 %v2105_v23, %v1653_v32  ;;  %1669 = sbr.rel (%p2003_p5) target bundleno = 3069 (0xbfd), region = 112 }
 0xa62   : > { %v1663_v34 = vadd.f32 %v2106_v3, %v1658_v33 }
 0xa64   : > { %1665 = vst.msk [vmem:[#allocation2 + $0x8] sm:$0xff] %vm911_vm8, %v1663_v34 }
 0xa65   : > { %1688 = vmatpush.msra.mxu0 %v1663_v34  ;;  %v1670_v35 = vld [vmem:[%s2681_s0] sm:$0x3]  ;;  %v2040_v61 = vld [vmem:[%s2682_s23 + $0x8] sm:$0xff] }
 0xa66   : > { %1724 = vmatpush.bf16.msra.mxu1 %v2040_v61  ;;  %v2039_v36 = vld [vmem:[%s2682_s23] sm:$0xff]  ;;  %v2042_v39 = vld [vmem:[%s2683_s29 + $0x8] sm:$0xff] }
 0xa67   : > { %1689 = vmatpush.msra.mxu0 %v1662_v29  ;;  %1762 = vmatpush.bf16.msra.mxu2 %v2042_v39  ;;  %v2041_v40 = vld [vmem:[%s2683_s29] sm:$0xff] }
 0xa68   : > { %2004 = vmatmul.msk.f32.vlgmr.msra.gmra.mxu0 %vm977_vm10, %v1670_v35  ;;  %v2153_v41 = vld [vmem:[%s2684_s27] ss:$0 sm:$0xff]  ;;  %vm1769_vm10 = vcmask 254976  }
 0xa69   : > { %v2154_v46 = vld [vmem:[%s2685_s19] ss:$0 sm:$0xff] }
 0xa6a   : > { %1725 = vmatpush.bf16.msra.mxu1 %v2039_v36 }
 0xa6b   : > { %1763 = vmatpush.bf16.msra.mxu2 %v2041_v40 }
 0xae5   : > { %v1691_v37 = vpop.f32.mrf.mxu0 }
 0xae6   : > { %v1694_v38 = vpack.c.bf16 %v1691_v37, %v1691_v37 }
 0xae8   : > { %2013 = vmatmul.msk.bf16.vlgmr.msra.gmra.mxu1 %vm911_vm8, %v1694_v38 }
 0xb65   : > { %v1727_v42 = vpop.f32.mrf.mxu1 }
 0xb66   : > { %v1728_v0 = vadd.f32 %v2153_v41, %v1727_v42 }
 0xb68   : > { %2155 = vtanh.f32 %v1728_v0 }
 0xb6d   : > { %v1729_v51 = vpop.f32.mrf.mxu1 }
 0xb6e   : > { %v2156_v44 = vpop.eup %2155 }
 0xb6f   : > { %v1732_v45 = vpack.c.bf16 %v2156_v44, %v2156_v44 }
 0xb71   : > { %2022 = vmatmul.msk.bf16.vlgmr.msra.gmra.mxu2 %vm911_vm8, %v1732_v45 }
 0xbf4   : > { %v1765_v52 = vpop.f32.mrf.mxu2 }
 0xbf5   : > { %v1766_v47 = vadd.f32 %v2154_v46, %v1765_v52 }
 0xbf7   : > { %1770 = vst.msk [vmem:[#allocation3] sm:$0x3] %vm1769_vm10, %v1766_v47 }
 0xbfc   : > { %v1767_v48 = vpop.f32.mrf.mxu2 }
 0xbfd PF: > { %p2047_p6 = scmp.eq.s32.totalorder %s2327_s25, 1  ;;  %s2210_s26 = smov [#allocation3]  }
 0xbfe   : > { %s1777_s0 = sshll.u32 %s2210_s26, 4  ;;  %s2686_s2 = sld [smem:[#allocation18_spill]]  ;;  %s1778_s0 = int_to_ptr.vmem [resolvable:$true] %s1777_s0 }
 0xc04   : > { %s1779_s17 = sshll.u32 %s2686_s2, 4  ;;  %s1780_s17 = int_to_ptr.hbm [resolvable:$true] %s1779_s17 }
 0xc05   : > { %2044 = dma.vmem_to_hbm [thread:$0]  (%p2047_p6), %s1778_s0, 32, %s1780_s17, [#allocation4]  }
 0xc06   : > { %2190 = dma.done.wait (%p2047_p6), [#allocation4], 32  }
 0xc07   : > { %2192 = vsyncadd (%p2047_p6), [#allocation4], 4294967264 }
 0xc08 PF: > { %s2687_s5 = sld [smem:[#allocation6_spill]] }
 0xc0e   : > { %s32_s2 = sadd.s32 1, %s2687_s5  }
 0xc0f   : > { %p29_p7 = scmp.ge.s32.totalorder %s32_s2, 4  }
 0xc11   :  { %31 = sbr.rel (!%p29_p7) target bundleno = 14 (0xe), region = 172 }
 0xc16   :  { %1793 = vsyncpa [#allocation4], 1 }
 0xc17   :  { %1795 = vsyncpa [#allocation4 + $0x1], 1 }

</bundles_post_ra>
